<compile_context>
chip_gen: v5e
topology: v5e:2x2
jax: 0.10.0
libtpu: 0.0.40
codegen_flags: <defaults>
</compile_context>

<pallas_src>
from functools import partial

import jax
import jax.numpy as jnp
from jax import lax
from jax.experimental import pallas as pl
from jax.experimental.pallas import tpu as pltpu


# ---------------------------------------------------------------------------
# Tiled linear kernels:  y = x @ w (+ b)
# ---------------------------------------------------------------------------
def _matmul_kernel(x_ref, w_ref, o_ref, acc_ref):
    @pl.when(pl.program_id(2) == 0)
    def _():
        acc_ref[...] = jnp.zeros_like(acc_ref)

    acc_ref[...] += jnp.dot(x_ref[...], w_ref[...],
                            preferred_element_type=jnp.float32)

    @pl.when(pl.program_id(2) == pl.num_programs(2) - 1)
    def _():
        o_ref[...] = acc_ref[...].astype(o_ref.dtype)


def _matmul_bias_kernel(x_ref, w_ref, b_ref, o_ref, acc_ref):
    @pl.when(pl.program_id(2) == 0)
    def _():
        acc_ref[...] = jnp.zeros_like(acc_ref)

    acc_ref[...] += jnp.dot(x_ref[...], w_ref[...],
                            preferred_element_type=jnp.float32)

    @pl.when(pl.program_id(2) == pl.num_programs(2) - 1)
    def _():
        o_ref[...] = (acc_ref[...] + b_ref[...].astype(jnp.float32)
                      ).astype(o_ref.dtype)


def _pick_tile(dim, candidates, align):
    """Largest candidate evenly dividing dim; else (dim <= cap) the full dim,
    which is always layout-legal; else the largest `align`-multiple divisor of
    dim not exceeding the largest candidate (bounds per-buffer bytes and keeps
    several grid steps so the software pipeline overlaps DMA)."""
    for t in candidates:
        if dim >= t and dim % t == 0:
            return t
    cap = max(candidates)
    if dim <= cap:
        return dim
    for t in range(cap - cap % align, 0, -align):
        if dim % t == 0:
            return t
    # TODO(synk): masked / ragged last tile for dims with no aligned divisor.
    return dim


def _clamp_vmem(need_bytes):
    # Explicit scoped-VMEM request: at least the 32 MiB v6e/v7x default, never
    # above v7x's 64 MiB physical VMEM.
    return int(min(max(need_bytes, 32 << 20), 64 << 20))


def pallas_linear(x2d, w, b=None):
    """x2d: (M, K), w: (K, Nout), b: (Nout,) or None -> (M, Nout)."""
    M, K = x2d.shape
    Nout = w.shape[1]
    itemsize = jnp.dtype(x2d.dtype).itemsize

    # 256/512-multiple tiles feed the v6e/v7x 2x256 MXU (128 multiples already
    # fill v5e's 4x128 MXU); full dims at toy sizes.
    tm = _pick_tile(M, (512, 256, 128), 8)
    tn = _pick_tile(Nout, (512, 256, 128), 128)
    tk = _pick_tile(K, (512, 256, 128), 128)
    grid = (M // tm, Nout // tn, K // tk)

    x_spec = pl.BlockSpec((tm, tk), lambda i, j, k: (i, k))
    w_spec = pl.BlockSpec((tk, tn), lambda i, j, k: (k, j))
    o_spec = pl.BlockSpec((tm, tn), lambda i, j, k: (i, j))
    scratch = [pltpu.VMEM((tm, tn), jnp.float32)]

    # double-buffered x/w/o (+bias) blocks + f32 accumulator, 1.5x headroom
    need = 2 * (tm * tk + tk * tn + tm * tn + tn) * itemsize + tm * tn * 4
    cparams = pltpu.CompilerParams(
        dimension_semantics=("parallel", "parallel", "arbitrary"),
        vmem_limit_bytes=_clamp_vmem(int(need * 1.5)))

    if b is None:
        return pl.pallas_call(
            _matmul_kernel,
            out_shape=jax.ShapeDtypeStruct((M, Nout), x2d.dtype),
            grid=grid,
            in_specs=[x_spec, w_spec],
            out_specs=o_spec,
            scratch_shapes=scratch,
            compiler_params=cparams,
        )(x2d, w)

    b2d = b.reshape(1, Nout)
    b_spec = pl.BlockSpec((1, tn), lambda i, j, k: (0, j))
    return pl.pallas_call(
        _matmul_bias_kernel,
        out_shape=jax.ShapeDtypeStruct((M, Nout), x2d.dtype),
        grid=grid,
        in_specs=[x_spec, w_spec, b_spec],
        out_specs=o_spec,
        scratch_shapes=scratch,
        compiler_params=cparams,
    )(x2d, w, b2d)


# ---------------------------------------------------------------------------
# Attention core.
# grid = (B, num_head_groups); each step processes `heads` heads of one batch
# element.  qkv is viewed as (B, N, 3, C); the in_spec brings in only this
# group's q/k/v columns.  Output block is the lane-dense (N, heads*hd) slab of
# (B, N, C); probs block is (heads, N, N) of (B, H, N, N).
# ---------------------------------------------------------------------------
def _attn_kernel(qkv_ref, o_ref, *p_refs, heads, head_dim):
    p_ref = p_refs[0] if p_refs else None
    hd = head_dim
    pair = 2 if heads % 2 == 0 else 1      # head-pair stores (hd=64 -> 128 lanes)
    for j0 in range(0, heads, pair):
        outs = []
        for j in range(j0, j0 + pair):
            lo = j * hd
            q = qkv_ref[0, :, 0, lo:lo + hd]               # (N, hd), input dtype
            k = qkv_ref[0, :, 1, lo:lo + hd]
            v = qkv_ref[0, :, 2, lo:lo + hd]
            # softmax scale already folded into W_qkv's q columns; contract the
            # last dims so no explicit k transpose is materialized.
            s = lax.dot_general(q, k, (((1,), (1,)), ((), ())),
                                preferred_element_type=jnp.float32)   # (N, N)
            m = jnp.max(s, axis=-1, keepdims=True)
            e = jnp.exp(s - m)
            denom = jnp.sum(e, axis=-1, keepdims=True)
            p = e * (1.0 / denom)                          # exact softmax probs
            if p_ref is not None:
                p_ref[0, j] = p.astype(p_ref.dtype)
            outs.append(jnp.dot(p.astype(v.dtype), v,
                                preferred_element_type=jnp.float32))
        blk = outs[0] if pair == 1 else jnp.concatenate(outs, axis=-1)
        o_ref[0, :, j0 * hd:(j0 + pair) * hd] = blk.astype(o_ref.dtype)


def _heads_per_group(num_heads, head_dim):
    """Smallest head count whose combined lane width is a 128 multiple (so qkv /
    output blocks are lane-dense and layout-legal); all heads otherwise."""
    for g in range(1, num_heads):
        if num_heads % g == 0 and (g * head_dim) % 128 == 0:
            return g
    return num_heads


def pallas_attention_core(qkv, num_heads, head_dim, return_probs=True):
    """qkv: (B, N, 3, C) -> out (B, N, C) [, probs (B, H, N, N)]."""
    B, N, _, C = qkv.shape
    dtype = qkv.dtype
    itemsize = jnp.dtype(dtype).itemsize

    g = _heads_per_group(num_heads, head_dim)
    gc = g * head_dim
    n_groups = num_heads // g
    grid = (B, n_groups)

    in_specs = [pl.BlockSpec((1, N, 3, gc), lambda b, h: (b, 0, 0, h))]
    o_spec = pl.BlockSpec((1, N, gc), lambda b, h: (b, 0, h))
    out_shape = jax.ShapeDtypeStruct((B, N, C), dtype)

    # double-buffered qkv/out(/probs) blocks + f32 score/exp intermediates
    need = 2 * (3 * N * gc + N * gc) * itemsize + 4 * N * N * 4 + 4 * N * gc * 4
    if return_probs:
        need += 2 * g * N * N * itemsize
        out_shape = (out_shape,
                     jax.ShapeDtypeStruct((B, num_heads, N, N), dtype))
        out_specs = (o_spec,
                     pl.BlockSpec((1, g, N, N), lambda b, h: (b, h, 0, 0)))
    else:
        out_specs = o_spec

    return pl.pallas_call(
        partial(_attn_kernel, heads=g, head_dim=head_dim),
        out_shape=out_shape,
        grid=grid,
        in_specs=in_specs,
        out_specs=out_specs,
        compiler_params=pltpu.CompilerParams(
            dimension_semantics=("parallel", "parallel"),
            vmem_limit_bytes=_clamp_vmem(int(need * 1.5))),
    )(qkv)


# ---------------------------------------------------------------------------
# Full module forward (glue in plain JAX, hot paths in Pallas)
# ---------------------------------------------------------------------------
def prepare_params(params, num_heads):
    """One-time prep: hoist the weight transposes out of the forward and fold
    the softmax scale (head_dim**-0.5) into W_qkv's q columns."""
    C = params["w_proj"].shape[0]
    head_dim = C // num_heads
    scale = head_dim ** (-0.5)
    w_qkv_t = jnp.asarray(params["w_qkv"]).T               # (C, 3C)
    w_qkv_t = w_qkv_t.at[:, :C].multiply(scale)            # scale the q columns
    return {
        "w_qkv_t": w_qkv_t,
        "w_proj_t": jnp.asarray(params["w_proj"]).T,       # (C, C)
        "b_proj": jnp.asarray(params["b_proj"]),
    }


def attention_forward(x, prepared, num_heads):
    """x: (B, N, C) -> (y (B, N, C), attn (B, H, N, N)); matches Attention.forward."""
    B, N, C = x.shape
    head_dim = C // num_heads

    # qkv projection (qkv_bias=False -> bias-free kernel);
    # q_norm / k_norm are nn.Identity (qk_norm=False).
    qkv = pallas_linear(x.reshape(B * N, C), prepared["w_qkv_t"])   # (B*N, 3C)
    qkv = qkv.reshape(B, N, 3, C)                                   # free view

    out, attn = pallas_attention_core(qkv, num_heads, head_dim,
                                      return_probs=True)

    # output projection; attn_drop / proj_drop are identity (p = 0.0)
    y = pallas_linear(out.reshape(B * N, C), prepared["w_proj_t"],
                      prepared["b_proj"]).reshape(B, N, C)
    return y, attn


# ---------------------------------------------------------------------------
# Pure-JAX reference (for correctness check)
# ---------------------------------------------------------------------------
def attention_reference(x, params, num_heads):
    B, N, C = x.shape
    hd = C // num_heads
    scale = hd ** (-0.5)
    qkv = x @ params["w_qkv"].T
    qkv = qkv.reshape(B, N, 3, num_heads, hd).transpose(2, 0, 3, 1, 4)
    q, k, v = qkv[0], qkv[1], qkv[2]
    s = jnp.einsum("bhqd,bhkd->bhqk", q, k) * scale
    p = jax.nn.softmax(s, axis=-1)
    o = jnp.einsum("bhqk,bhkd->bhqd", p, v)
    y = o.transpose(0, 2, 1, 3).reshape(B, N, C)
    y = y @ params["w_proj"].T + params["b_proj"]
    return y, p


if __name__ == "__main__":
    # Small shapes consistent with the module: B=2, seq N=8, dim C=64, heads=8.
    B, N, C, H = 2, 8, 64, 8

    key = jax.random.PRNGKey(0)
    kx, kq, kp, kb = jax.random.split(key, 4)
    x = jax.random.normal(kx, (B, N, C), jnp.float32)
    params = {
        "w_qkv": jax.random.normal(kq, (3 * C, C), jnp.float32) * 0.05,
        "w_proj": jax.random.normal(kp, (C, C), jnp.float32) * 0.05,
        "b_proj": jax.random.normal(kb, (C,), jnp.float32) * 0.01,
    }

    prepared = prepare_params(params, num_heads=H)
    fwd = jax.jit(partial(attention_forward, num_heads=H))
    y, attn = fwd(x, prepared)
    y = jax.block_until_ready(y)
    attn = jax.block_until_ready(attn)

    y_ref, attn_ref = attention_reference(x, params, num_heads=H)
    assert y.shape == (B, N, C) and attn.shape == (B, H, N, N)
    assert jnp.allclose(y, y_ref, atol=2e-3, rtol=2e-3), \
        float(jnp.max(jnp.abs(y - y_ref)))
    assert jnp.allclose(attn, attn_ref, atol=2e-3, rtol=2e-3), \
        float(jnp.max(jnp.abs(attn - attn_ref)))

    print("KERNEL_OK")
</pallas_src>

<mosaic_0001>
module attributes {stable_mosaic.version = 11 : i64} {
  func.func @_matmul_kernel(%arg0: i32, %arg1: i32, %arg2: i32, %arg3: memref<16x64xf32, #tpu.memory_space<vmem>>, %arg4: memref<64x192xf32, #tpu.memory_space<vmem>>, %arg5: memref<16x192xf32, #tpu.memory_space<vmem>>, %arg6: memref<16x192xf32, #tpu.memory_space<vmem>>) attributes {dimension_semantics = [#tpu.dimension_semantics<parallel>, #tpu.dimension_semantics<parallel>, #tpu.dimension_semantics<arbitrary>], iteration_bounds = array<i64: 1, 1, 1>, scalar_prefetch = 0 : i64, scratch_operands = 1 : i64, tpu.core_type = #tpu.core_type<tc>, window_params = [{transform_indices = @transform_0, window_bounds = array<i64: 16, 64>}, {transform_indices = @transform_1, window_bounds = array<i64: 64, 192>}, {transform_indices = @transform_2, window_bounds = array<i64: 16, 192>}]} {
    %c0_i32 = arith.constant 0 : i32
    %0 = arith.cmpi eq, %arg2, %c0_i32 : i32
    %1 = arith.extui %0 : i1 to i32
    %c0_i32_0 = arith.constant 0 : i32
    %2 = arith.cmpi ne, %1, %c0_i32_0 : i32
    scf.if %2 {
      %cst_10 = arith.constant 0.000000e+00 : f32
      %12 = vector.broadcast %cst_10 : f32 to vector<16x192xf32>
      %c0_11 = arith.constant 0 : index
      %c0_12 = arith.constant 0 : index
      %13 = vector.load %arg6[%c0_11, %c0_12] : memref<16x192xf32, #tpu.memory_space<vmem>>, vector<16x192xf32>
      tpu.vector_store %arg6[%c0_11, %c0_12], %12 {strides = array<i32>} : memref<16x192xf32, #tpu.memory_space<vmem>>, vector<16x192xf32>,
    } else {
    }
    %c0 = arith.constant 0 : index
    %c0_1 = arith.constant 0 : index
    %3 = vector.load %arg6[%c0, %c0_1] : memref<16x192xf32, #tpu.memory_space<vmem>>, vector<16x192xf32>
    %c0_2 = arith.constant 0 : index
    %c0_3 = arith.constant 0 : index
    %4 = vector.load %arg3[%c0_2, %c0_3] : memref<16x64xf32, #tpu.memory_space<vmem>>, vector<16x64xf32>
    %c0_4 = arith.constant 0 : index
    %c0_5 = arith.constant 0 : index
    %5 = vector.load %arg4[%c0_4, %c0_5] : memref<64x192xf32, #tpu.memory_space<vmem>>, vector<64x192xf32>
    %cst = arith.constant dense<0.000000e+00> : vector<16x192xf32>
    %6 = tpu.matmul %4, %5, %cst {dimension_numbers = #tpu.dot_dimension_numbers<[1], [0], [0], [1], [0, 0, 1, 1], [], []>} : vector<16x64xf32>, vector<64x192xf32>, vector<16x192xf32> -> vector<16x192xf32>
    %7 = arith.addf %3, %6 : vector<16x192xf32>
    %c0_6 = arith.constant 0 : index
    %c0_7 = arith.constant 0 : index
    %8 = vector.load %arg6[%c0_6, %c0_7] : memref<16x192xf32, #tpu.memory_space<vmem>>, vector<16x192xf32>
    tpu.vector_store %arg6[%c0_6, %c0_7], %7 {strides = array<i32>} : memref<16x192xf32, #tpu.memory_space<vmem>>, vector<16x192xf32>,
    %c0_i32_8 = arith.constant 0 : i32
    %9 = arith.cmpi eq, %arg2, %c0_i32_8 : i32
    %10 = arith.extui %9 : i1 to i32
    %c0_i32_9 = arith.constant 0 : i32
    %11 = arith.cmpi ne, %10, %c0_i32_9 : i32
    scf.if %11 {
      %c0_10 = arith.constant 0 : index
      %c0_11 = arith.constant 0 : index
      %12 = vector.load %arg6[%c0_10, %c0_11] : memref<16x192xf32, #tpu.memory_space<vmem>>, vector<16x192xf32>
      %c0_12 = arith.constant 0 : index
      %c0_13 = arith.constant 0 : index
      %13 = vector.load %arg5[%c0_12, %c0_13] : memref<16x192xf32, #tpu.memory_space<vmem>>, vector<16x192xf32>
      tpu.vector_store %arg5[%c0_12, %c0_13], %12 {strides = array<i32>} : memref<16x192xf32, #tpu.memory_space<vmem>>, vector<16x192xf32>,
    } else {
    }
    return
  }
  func.func @transform_0(%arg0: i32, %arg1: i32, %arg2: i32) -> (i32, i32) {
    %c0_i32 = arith.constant 0 : i32
    return %arg0, %arg2 : i32, i32
  }
  func.func @transform_1(%arg0: i32, %arg1: i32, %arg2: i32) -> (i32, i32) {
    %c0_i32 = arith.constant 0 : i32
    return %arg2, %arg1 : i32, i32
  }
  func.func @transform_2(%arg0: i32, %arg1: i32, %arg2: i32) -> (i32, i32) {
    %c0_i32 = arith.constant 0 : i32
    return %arg0, %arg1 : i32, i32
  }
}

module attributes {stable_mosaic.version = 11 : i64} {
  func.func @_matmul_bias_kernel(%arg0: i32, %arg1: i32, %arg2: i32, %arg3: memref<16x64xf32, #tpu.memory_space<vmem>>, %arg4: memref<64x64xf32, #tpu.memory_space<vmem>>, %arg5: memref<1x64xf32, #tpu.memory_space<vmem>>, %arg6: memref<16x64xf32, #tpu.memory_space<vmem>>, %arg7: memref<16x64xf32, #tpu.memory_space<vmem>>) attributes {dimension_semantics = [#tpu.dimension_semantics<parallel>, #tpu.dimension_semantics<parallel>, #tpu.dimension_semantics<arbitrary>], iteration_bounds = array<i64: 1, 1, 1>, scalar_prefetch = 0 : i64, scratch_operands = 1 : i64, tpu.core_type = #tpu.core_type<tc>, window_params = [{transform_indices = @transform_0, window_bounds = array<i64: 16, 64>}, {transform_indices = @transform_1, window_bounds = array<i64: 64, 64>}, {transform_indices = @transform_2, window_bounds = array<i64: 1, 64>}, {transform_indices = @transform_3, window_bounds = array<i64: 16, 64>}]} {
    %c0_i32 = arith.constant 0 : i32
    %0 = arith.cmpi eq, %arg2, %c0_i32 : i32
    %1 = arith.extui %0 : i1 to i32
    %c0_i32_0 = arith.constant 0 : i32
    %2 = arith.cmpi ne, %1, %c0_i32_0 : i32
    scf.if %2 {
      %cst_10 = arith.constant 0.000000e+00 : f32
      %12 = vector.broadcast %cst_10 : f32 to vector<16x64xf32>
      %c0_11 = arith.constant 0 : index
      %c0_12 = arith.constant 0 : index
      %13 = vector.load %arg7[%c0_11, %c0_12] : memref<16x64xf32, #tpu.memory_space<vmem>>, vector<16x64xf32>
      tpu.vector_store %arg7[%c0_11, %c0_12], %12 {strides = array<i32>} : memref<16x64xf32, #tpu.memory_space<vmem>>, vector<16x64xf32>,
    } else {
    }
    %c0 = arith.constant 0 : index
    %c0_1 = arith.constant 0 : index
    %3 = vector.load %arg7[%c0, %c0_1] : memref<16x64xf32, #tpu.memory_space<vmem>>, vector<16x64xf32>
    %c0_2 = arith.constant 0 : index
    %c0_3 = arith.constant 0 : index
    %4 = vector.load %arg3[%c0_2, %c0_3] : memref<16x64xf32, #tpu.memory_space<vmem>>, vector<16x64xf32>
    %c0_4 = arith.constant 0 : index
    %c0_5 = arith.constant 0 : index
    %5 = vector.load %arg4[%c0_4, %c0_5] : memref<64x64xf32, #tpu.memory_space<vmem>>, vector<64x64xf32>
    %cst = arith.constant dense<0.000000e+00> : vector<16x64xf32>
    %6 = tpu.matmul %4, %5, %cst {dimension_numbers = #tpu.dot_dimension_numbers<[1], [0], [0], [1], [0, 0, 1, 1], [], []>} : vector<16x64xf32>, vector<64x64xf32>, vector<16x64xf32> -> vector<16x64xf32>
    %7 = arith.addf %3, %6 : vector<16x64xf32>
    %c0_6 = arith.constant 0 : index
    %c0_7 = arith.constant 0 : index
    %8 = vector.load %arg7[%c0_6, %c0_7] : memref<16x64xf32, #tpu.memory_space<vmem>>, vector<16x64xf32>
    tpu.vector_store %arg7[%c0_6, %c0_7], %7 {strides = array<i32>} : memref<16x64xf32, #tpu.memory_space<vmem>>, vector<16x64xf32>,
    %c0_i32_8 = arith.constant 0 : i32
    %9 = arith.cmpi eq, %arg2, %c0_i32_8 : i32
    %10 = arith.extui %9 : i1 to i32
    %c0_i32_9 = arith.constant 0 : i32
    %11 = arith.cmpi ne, %10, %c0_i32_9 : i32
    scf.if %11 {
      %c0_10 = arith.constant 0 : index
      %c0_11 = arith.constant 0 : index
      %12 = vector.load %arg7[%c0_10, %c0_11] : memref<16x64xf32, #tpu.memory_space<vmem>>, vector<16x64xf32>
      %c0_12 = arith.constant 0 : index
      %c0_13 = arith.constant 0 : index
      %13 = vector.load %arg5[%c0_12, %c0_13] : memref<1x64xf32, #tpu.memory_space<vmem>>, vector<1x64xf32>
      %14 = vector.broadcast %13 : vector<1x64xf32> to vector<16x64xf32>
      %15 = arith.addf %12, %14 : vector<16x64xf32>
      %c0_14 = arith.constant 0 : index
      %c0_15 = arith.constant 0 : index
      %16 = vector.load %arg6[%c0_14, %c0_15] : memref<16x64xf32, #tpu.memory_space<vmem>>, vector<16x64xf32>
      tpu.vector_store %arg6[%c0_14, %c0_15], %15 {strides = array<i32>} : memref<16x64xf32, #tpu.memory_space<vmem>>, vector<16x64xf32>,
    } else {
    }
    return
  }
  func.func @transform_0(%arg0: i32, %arg1: i32, %arg2: i32) -> (i32, i32) {
    %c0_i32 = arith.constant 0 : i32
    return %arg0, %arg2 : i32, i32
  }
  func.func @transform_1(%arg0: i32, %arg1: i32, %arg2: i32) -> (i32, i32) {
    %c0_i32 = arith.constant 0 : i32
    return %arg2, %arg1 : i32, i32
  }
  func.func @transform_2(%arg0: i32, %arg1: i32, %arg2: i32) -> (i32, i32) {
    %c0_i32 = arith.constant 0 : i32
    %c0_i32_0 = arith.constant 0 : i32
    return %c0_i32, %arg1 : i32, i32
  }
  func.func @transform_3(%arg0: i32, %arg1: i32, %arg2: i32) -> (i32, i32) {
    %c0_i32 = arith.constant 0 : i32
    return %arg0, %arg1 : i32, i32
  }
}

module attributes {stable_mosaic.version = 11 : i64} {
  func.func @_attn_kernel(%arg0: i32, %arg1: i32, %arg2: memref<1x8x3x64xf32, #tpu.memory_space<vmem>>, %arg3: memref<1x8x64xf32, #tpu.memory_space<vmem>>, %arg4: memref<1x8x8x8xf32, #tpu.memory_space<vmem>>) attributes {dimension_semantics = [#tpu.dimension_semantics<parallel>, #tpu.dimension_semantics<parallel>], iteration_bounds = array<i64: 2, 1>, scalar_prefetch = 0 : i64, scratch_operands = 0 : i64, tpu.core_type = #tpu.core_type<tc>, window_params = [{transform_indices = @transform_0, window_bounds = array<i64: 1, 8, 3, 64>}, {transform_indices = @transform_1, window_bounds = array<i64: 1, 8, 64>}, {transform_indices = @transform_2, window_bounds = array<i64: 1, 8, 8, 8>}]} {
    %c0 = arith.constant 0 : index
    %c0_0 = arith.constant 0 : index
    %c0_1 = arith.constant 0 : index
    %c0_2 = arith.constant 0 : index
    %0 = vector.load %arg2[%c0, %c0_0, %c0_1, %c0_2] : memref<1x8x3x64xf32, #tpu.memory_space<vmem>>, vector<1x8x1x8xf32>
    %1 = vector.shape_cast %0 : vector<1x8x1x8xf32> to vector<8x8xf32>
    %c0_3 = arith.constant 0 : index
    %c0_4 = arith.constant 0 : index
    %c1 = arith.constant 1 : index
    %c0_5 = arith.constant 0 : index
    %2 = vector.load %arg2[%c0_3, %c0_4, %c1, %c0_5] : memref<1x8x3x64xf32, #tpu.memory_space<vmem>>, vector<1x8x1x8xf32>
    %3 = vector.shape_cast %2 : vector<1x8x1x8xf32> to vector<8x8xf32>
    %c0_6 = arith.constant 0 : index
    %c0_7 = arith.constant 0 : index
    %c2 = arith.constant 2 : index
    %c0_8 = arith.constant 0 : index
    %4 = vector.load %arg2[%c0_6, %c0_7, %c2, %c0_8] : memref<1x8x3x64xf32, #tpu.memory_space<vmem>>, vector<1x8x1x8xf32>
    %5 = vector.shape_cast %4 : vector<1x8x1x8xf32> to vector<8x8xf32>
    %cst = arith.constant dense<0.000000e+00> : vector<8x8xf32>
    %6 = tpu.matmul %1, %3, %cst {dimension_numbers = #tpu.dot_dimension_numbers<[1], [1], [0], [0], [0, 0, 1, 0], [], []>} : vector<8x8xf32>, vector<8x8xf32>, vector<8x8xf32> -> vector<8x8xf32>
    %cst_9 = arith.constant dense<0xFF800000> : vector<8xf32>
    %7 = vector.multi_reduction <maximumf>, %6, %cst_9 [1] : vector<8x8xf32> to vector<8xf32>
    %8 = vector.shape_cast %7 : vector<8xf32> to vector<8x1xf32>
    %9 = vector.broadcast %8 : vector<8x1xf32> to vector<8x8xf32>
    %10 = arith.subf %6, %9 : vector<8x8xf32>
    %11 = math.exp %10 : vector<8x8xf32>
    %cst_10 = arith.constant dense<0.000000e+00> : vector<8xf32>
    %12 = vector.multi_reduction <add>, %11, %cst_10 [1] : vector<8x8xf32> to vector<8xf32>
    %13 = vector.shape_cast %12 : vector<8xf32> to vector<8x1xf32>
    %cst_11 = arith.constant 1.000000e+00 : f32
    %14 = vector.broadcast %cst_11 : f32 to vector<8x1xf32>
    %15 = arith.divf %14, %13 : vector<8x1xf32>
    %16 = vector.broadcast %15 : vector<8x1xf32> to vector<8x8xf32>
    %17 = arith.mulf %11, %16 : vector<8x8xf32>
    %c0_12 = arith.constant 0 : index
    %c0_13 = arith.constant 0 : index
    %c0_14 = arith.constant 0 : index
    %c0_15 = arith.constant 0 : index
    %18 = vector.load %arg4[%c0_12, %c0_13, %c0_14, %c0_15] : memref<1x8x8x8xf32, #tpu.memory_space<vmem>>, vector<1x1x8x8xf32>
    %19 = vector.shape_cast %18 : vector<1x1x8x8xf32> to vector<8x8xf32>
    %20 = vector.shape_cast %17 : vector<8x8xf32> to vector<1x1x8x8xf32>
    tpu.vector_store %arg4[%c0_12, %c0_13, %c0_14, %c0_15], %20 {strides = array<i32>} : memref<1x8x8x8xf32, #tpu.memory_space<vmem>>, vector<1x1x8x8xf32>,
    %cst_16 = arith.constant dense<0.000000e+00> : vector<8x8xf32>
    %21 = tpu.matmul %17, %5, %cst_16 {dimension_numbers = #tpu.dot_dimension_numbers<[1], [0], [0], [1], [0, 0, 1, 1], [], []>} : vector<8x8xf32>, vector<8x8xf32>, vector<8x8xf32> -> vector<8x8xf32>
    %c0_17 = arith.constant 0 : index
    %c0_18 = arith.constant 0 : index
    %c0_19 = arith.constant 0 : index
    %c8 = arith.constant 8 : index
    %22 = vector.load %arg2[%c0_17, %c0_18, %c0_19, %c8] : memref<1x8x3x64xf32, #tpu.memory_space<vmem>>, vector<1x8x1x8xf32>
    %23 = vector.shape_cast %22 : vector<1x8x1x8xf32> to vector<8x8xf32>
    %c0_20 = arith.constant 0 : index
    %c0_21 = arith.constant 0 : index
    %c1_22 = arith.constant 1 : index
    %c8_23 = arith.constant 8 : index
    %24 = vector.load %arg2[%c0_20, %c0_21, %c1_22, %c8_23] : memref<1x8x3x64xf32, #tpu.memory_space<vmem>>, vector<1x8x1x8xf32>
    %25 = vector.shape_cast %24 : vector<1x8x1x8xf32> to vector<8x8xf32>
    %c0_24 = arith.constant 0 : index
    %c0_25 = arith.constant 0 : index
    %c2_26 = arith.constant 2 : index
    %c8_27 = arith.constant 8 : index
    %26 = vector.load %arg2[%c0_24, %c0_25, %c2_26, %c8_27] : memref<1x8x3x64xf32, #tpu.memory_space<vmem>>, vector<1x8x1x8xf32>
    %27 = vector.shape_cast %26 : vector<1x8x1x8xf32> to vector<8x8xf32>
    %cst_28 = arith.constant dense<0.000000e+00> : vector<8x8xf32>
    %28 = tpu.matmul %23, %25, %cst_28 {dimension_numbers = #tpu.dot_dimension_numbers<[1], [1], [0], [0], [0, 0, 1, 0], [], []>} : vector<8x8xf32>, vector<8x8xf32>, vector<8x8xf32> -> vector<8x8xf32>
    %cst_29 = arith.constant dense<0xFF800000> : vector<8xf32>
    %29 = vector.multi_reduction <maximumf>, %28, %cst_29 [1] : vector<8x8xf32> to vector<8xf32>
    %30 = vector.shape_cast %29 : vector<8xf32> to vector<8x1xf32>
    %31 = vector.broadcast %30 : vector<8x1xf32> to vector<8x8xf32>
    %32 = arith.subf %28, %31 : vector<8x8xf32>
    %33 = math.exp %32 : vector<8x8xf32>
    %cst_30 = arith.constant dense<0.000000e+00> : vector<8xf32>
    %34 = vector.multi_reduction <add>, %33, %cst_30 [1] : vector<8x8xf32> to vector<8xf32>
    %35 = vector.shape_cast %34 : vector<8xf32> to vector<8x1xf32>
    %cst_31 = arith.constant 1.000000e+00 : f32
    %36 = vector.broadcast %cst_31 : f32 to vector<8x1xf32>
    %37 = arith.divf %36, %35 : vector<8x1xf32>
    %38 = vector.broadcast %37 : vector<8x1xf32> to vector<8x8xf32>
    %39 = arith.mulf %33, %38 : vector<8x8xf32>
    %c0_32 = arith.constant 0 : index
    %c1_33 = arith.constant 1 : index
    %c0_34 = arith.constant 0 : index
    %c0_35 = arith.constant 0 : index
    %40 = vector.load %arg4[%c0_32, %c1_33, %c0_34, %c0_35] : memref<1x8x8x8xf32, #tpu.memory_space<vmem>>, vector<1x1x8x8xf32>
    %41 = vector.shape_cast %40 : vector<1x1x8x8xf32> to vector<8x8xf32>
    %42 = vector.shape_cast %39 : vector<8x8xf32> to vector<1x1x8x8xf32>
    tpu.vector_store %arg4[%c0_32, %c1_33, %c0_34, %c0_35], %42 {strides = array<i32>} : memref<1x8x8x8xf32, #tpu.memory_space<vmem>>, vector<1x1x8x8xf32>,
    %cst_36 = arith.constant dense<0.000000e+00> : vector<8x8xf32>
    %43 = tpu.matmul %39, %27, %cst_36 {dimension_numbers = #tpu.dot_dimension_numbers<[1], [0], [0], [1], [0, 0, 1, 1], [], []>} : vector<8x8xf32>, vector<8x8xf32>, vector<8x8xf32> -> vector<8x8xf32>
    %44 = tpu.concatenate %21, %43 in 1 : vector<8x8xf32>, vector<8x8xf32> -> vector<8x16xf32>
    %c0_37 = arith.constant 0 : index
    %c0_38 = arith.constant 0 : index
    %c0_39 = arith.constant 0 : index
    %45 = vector.load %arg3[%c0_37, %c0_38, %c0_39] : memref<1x8x64xf32, #tpu.memory_space<vmem>>, vector<1x8x16xf32>
    %46 = vector.shape_cast %45 : vector<1x8x16xf32> to vector<8x16xf32>
    %47 = vector.shape_cast %44 : vector<8x16xf32> to vector<1x8x16xf32>
    tpu.vector_store %arg3[%c0_37, %c0_38, %c0_39], %47 {strides = array<i32>} : memref<1x8x64xf32, #tpu.memory_space<vmem>>, vector<1x8x16xf32>,
    %c0_40 = arith.constant 0 : index
    %c0_41 = arith.constant 0 : index
    %c0_42 = arith.constant 0 : index
    %c16 = arith.constant 16 : index
    %48 = vector.load %arg2[%c0_40, %c0_41, %c0_42, %c16] : memref<1x8x3x64xf32, #tpu.memory_space<vmem>>, vector<1x8x1x8xf32>
    %49 = vector.shape_cast %48 : vector<1x8x1x8xf32> to vector<8x8xf32>
    %c0_43 = arith.constant 0 : index
    %c0_44 = arith.constant 0 : index
    %c1_45 = arith.constant 1 : index
    %c16_46 = arith.constant 16 : index
    %50 = vector.load %arg2[%c0_43, %c0_44, %c1_45, %c16_46] : memref<1x8x3x64xf32, #tpu.memory_space<vmem>>, vector<1x8x1x8xf32>
    %51 = vector.shape_cast %50 : vector<1x8x1x8xf32> to vector<8x8xf32>
    %c0_47 = arith.constant 0 : index
    %c0_48 = arith.constant 0 : index
    %c2_49 = arith.constant 2 : index
    %c16_50 = arith.constant 16 : index
    %52 = vector.load %arg2[%c0_47, %c0_48, %c2_49, %c16_50] : memref<1x8x3x64xf32, #tpu.memory_space<vmem>>, vector<1x8x1x8xf32>
    %53 = vector.shape_cast %52 : vector<1x8x1x8xf32> to vector<8x8xf32>
    %cst_51 = arith.constant dense<0.000000e+00> : vector<8x8xf32>
    %54 = tpu.matmul %49, %51, %cst_51 {dimension_numbers = #tpu.dot_dimension_numbers<[1], [1], [0], [0], [0, 0, 1, 0], [], []>} : vector<8x8xf32>, vector<8x8xf32>, vector<8x8xf32> -> vector<8x8xf32>
    %cst_52 = arith.constant dense<0xFF800000> : vector<8xf32>
    %55 = vector.multi_reduction <maximumf>, %54, %cst_52 [1] : vector<8x8xf32> to vector<8xf32>
    %56 = vector.shape_cast %55 : vector<8xf32> to vector<8x1xf32>
    %57 = vector.broadcast %56 : vector<8x1xf32> to vector<8x8xf32>
    %58 = arith.subf %54, %57 : vector<8x8xf32>
    %59 = math.exp %58 : vector<8x8xf32>
    %cst_53 = arith.constant dense<0.000000e+00> : vector<8xf32>
    %60 = vector.multi_reduction <add>, %59, %cst_53 [1] : vector<8x8xf32> to vector<8xf32>
    %61 = vector.shape_cast %60 : vector<8xf32> to vector<8x1xf32>
    %cst_54 = arith.constant 1.000000e+00 : f32
    %62 = vector.broadcast %cst_54 : f32 to vector<8x1xf32>
    %63 = arith.divf %62, %61 : vector<8x1xf32>
    %64 = vector.broadcast %63 : vector<8x1xf32> to vector<8x8xf32>
    %65 = arith.mulf %59, %64 : vector<8x8xf32>
    %c0_55 = arith.constant 0 : index
    %c2_56 = arith.constant 2 : index
    %c0_57 = arith.constant 0 : index
    %c0_58 = arith.constant 0 : index
    %66 = vector.load %arg4[%c0_55, %c2_56, %c0_57, %c0_58] : memref<1x8x8x8xf32, #tpu.memory_space<vmem>>, vector<1x1x8x8xf32>
    %67 = vector.shape_cast %66 : vector<1x1x8x8xf32> to vector<8x8xf32>
    %68 = vector.shape_cast %65 : vector<8x8xf32> to vector<1x1x8x8xf32>
    tpu.vector_store %arg4[%c0_55, %c2_56, %c0_57, %c0_58], %68 {strides = array<i32>} : memref<1x8x8x8xf32, #tpu.memory_space<vmem>>, vector<1x1x8x8xf32>,
    %cst_59 = arith.constant dense<0.000000e+00> : vector<8x8xf32>
    %69 = tpu.matmul %65, %53, %cst_59 {dimension_numbers = #tpu.dot_dimension_numbers<[1], [0], [0], [1], [0, 0, 1, 1], [], []>} : vector<8x8xf32>, vector<8x8xf32>, vector<8x8xf32> -> vector<8x8xf32>
    %c0_60 = arith.constant 0 : index
    %c0_61 = arith.constant 0 : index
    %c0_62 = arith.constant 0 : index
    %c24 = arith.constant 24 : index
    %70 = vector.load %arg2[%c0_60, %c0_61, %c0_62, %c24] : memref<1x8x3x64xf32, #tpu.memory_space<vmem>>, vector<1x8x1x8xf32>
    %71 = vector.shape_cast %70 : vector<1x8x1x8xf32> to vector<8x8xf32>
    %c0_63 = arith.constant 0 : index
    %c0_64 = arith.constant 0 : index
    %c1_65 = arith.constant 1 : index
    %c24_66 = arith.constant 24 : index
    %72 = vector.load %arg2[%c0_63, %c0_64, %c1_65, %c24_66] : memref<1x8x3x64xf32, #tpu.memory_space<vmem>>, vector<1x8x1x8xf32>
    %73 = vector.shape_cast %72 : vector<1x8x1x8xf32> to vector<8x8xf32>
    %c0_67 = arith.constant 0 : index
    %c0_68 = arith.constant 0 : index
    %c2_69 = arith.constant 2 : index
    %c24_70 = arith.constant 24 : index
    %74 = vector.load %arg2[%c0_67, %c0_68, %c2_69, %c24_70] : memref<1x8x3x64xf32, #tpu.memory_space<vmem>>, vector<1x8x1x8xf32>
    %75 = vector.shape_cast %74 : vector<1x8x1x8xf32> to vector<8x8xf32>
    %cst_71 = arith.constant dense<0.000000e+00> : vector<8x8xf32>
    %76 = tpu.matmul %71, %73, %cst_71 {dimension_numbers = #tpu.dot_dimension_numbers<[1], [1], [0], [0], [0, 0, 1, 0], [], []>} : vector<8x8xf32>, vector<8x8xf32>, vector<8x8xf32> -> vector<8x8xf32>
    %cst_72 = arith.constant dense<0xFF800000> : vector<8xf32>
    %77 = vector.multi_reduction <maximumf>, %76, %cst_72 [1] : vector<8x8xf32> to vector<8xf32>
    %78 = vector.shape_cast %77 : vector<8xf32> to vector<8x1xf32>
    %79 = vector.broadcast %78 : vector<8x1xf32> to vector<8x8xf32>
    %80 = arith.subf %76, %79 : vector<8x8xf32>
    %81 = math.exp %80 : vector<8x8xf32>
    %cst_73 = arith.constant dense<0.000000e+00> : vector<8xf32>
    %82 = vector.multi_reduction <add>, %81, %cst_73 [1] : vector<8x8xf32> to vector<8xf32>
    %83 = vector.shape_cast %82 : vector<8xf32> to vector<8x1xf32>
    %cst_74 = arith.constant 1.000000e+00 : f32
    %84 = vector.broadcast %cst_74 : f32 to vector<8x1xf32>
    %85 = arith.divf %84, %83 : vector<8x1xf32>
    %86 = vector.broadcast %85 : vector<8x1xf32> to vector<8x8xf32>
    %87 = arith.mulf %81, %86 : vector<8x8xf32>
    %c0_75 = arith.constant 0 : index
    %c3 = arith.constant 3 : index
    %c0_76 = arith.constant 0 : index
    %c0_77 = arith.constant 0 : index
    %88 = vector.load %arg4[%c0_75, %c3, %c0_76, %c0_77] : memref<1x8x8x8xf32, #tpu.memory_space<vmem>>, vector<1x1x8x8xf32>
    %89 = vector.shape_cast %88 : vector<1x1x8x8xf32> to vector<8x8xf32>
    %90 = vector.shape_cast %87 : vector<8x8xf32> to vector<1x1x8x8xf32>
    tpu.vector_store %arg4[%c0_75, %c3, %c0_76, %c0_77], %90 {strides = array<i32>} : memref<1x8x8x8xf32, #tpu.memory_space<vmem>>, vector<1x1x8x8xf32>,
    %cst_78 = arith.constant dense<0.000000e+00> : vector<8x8xf32>
    %91 = tpu.matmul %87, %75, %cst_78 {dimension_numbers = #tpu.dot_dimension_numbers<[1], [0], [0], [1], [0, 0, 1, 1], [], []>} : vector<8x8xf32>, vector<8x8xf32>, vector<8x8xf32> -> vector<8x8xf32>
    %92 = tpu.concatenate %69, %91 in 1 : vector<8x8xf32>, vector<8x8xf32> -> vector<8x16xf32>
    %c0_79 = arith.constant 0 : index
    %c0_80 = arith.constant 0 : index
    %c16_81 = arith.constant 16 : index
    %93 = vector.load %arg3[%c0_79, %c0_80, %c16_81] : memref<1x8x64xf32, #tpu.memory_space<vmem>>, vector<1x8x16xf32>
    %94 = vector.shape_cast %93 : vector<1x8x16xf32> to vector<8x16xf32>
    %95 = vector.shape_cast %92 : vector<8x16xf32> to vector<1x8x16xf32>
    tpu.vector_store %arg3[%c0_79, %c0_80, %c16_81], %95 {strides = array<i32>} : memref<1x8x64xf32, #tpu.memory_space<vmem>>, vector<1x8x16xf32>,
    %c0_82 = arith.constant 0 : index
    %c0_83 = arith.constant 0 : index
    %c0_84 = arith.constant 0 : index
    %c32 = arith.constant 32 : index
    %96 = vector.load %arg2[%c0_82, %c0_83, %c0_84, %c32] : memref<1x8x3x64xf32, #tpu.memory_space<vmem>>, vector<1x8x1x8xf32>
    %97 = vector.shape_cast %96 : vector<1x8x1x8xf32> to vector<8x8xf32>
    %c0_85 = arith.constant 0 : index
    %c0_86 = arith.constant 0 : index
    %c1_87 = arith.constant 1 : index
    %c32_88 = arith.constant 32 : index
    %98 = vector.load %arg2[%c0_85, %c0_86, %c1_87, %c32_88] : memref<1x8x3x64xf32, #tpu.memory_space<vmem>>, vector<1x8x1x8xf32>
    %99 = vector.shape_cast %98 : vector<1x8x1x8xf32> to vector<8x8xf32>
    %c0_89 = arith.constant 0 : index
    %c0_90 = arith.constant 0 : index
    %c2_91 = arith.constant 2 : index
    %c32_92 = arith.constant 32 : index
    %100 = vector.load %arg2[%c0_89, %c0_90, %c2_91, %c32_92] : memref<1x8x3x64xf32, #tpu.memory_space<vmem>>, vector<1x8x1x8xf32>
    %101 = vector.shape_cast %100 : vector<1x8x1x8xf32> to vector<8x8xf32>
    %cst_93 = arith.constant dense<0.000000e+00> : vector<8x8xf32>
    %102 = tpu.matmul %97, %99, %cst_93 {dimension_numbers = #tpu.dot_dimension_numbers<[1], [1], [0], [0], [0, 0, 1, 0], [], []>} : vector<8x8xf32>, vector<8x8xf32>, vector<8x8xf32> -> vector<8x8xf32>
    %cst_94 = arith.constant dense<0xFF800000> : vector<8xf32>
    %103 = vector.multi_reduction <maximumf>, %102, %cst_94 [1] : vector<8x8xf32> to vector<8xf32>
    %104 = vector.shape_cast %103 : vector<8xf32> to vector<8x1xf32>
    %105 = vector.broadcast %104 : vector<8x1xf32> to vector<8x8xf32>
    %106 = arith.subf %102, %105 : vector<8x8xf32>
    %107 = math.exp %106 : vector<8x8xf32>
    %cst_95 = arith.constant dense<0.000000e+00> : vector<8xf32>
    %108 = vector.multi_reduction <add>, %107, %cst_95 [1] : vector<8x8xf32> to vector<8xf32>
    %109 = vector.shape_cast %108 : vector<8xf32> to vector<8x1xf32>
    %cst_96 = arith.constant 1.000000e+00 : f32
    %110 = vector.broadcast %cst_96 : f32 to vector<8x1xf32>
    %111 = arith.divf %110, %109 : vector<8x1xf32>
    %112 = vector.broadcast %111 : vector<8x1xf32> to vector<8x8xf32>
    %113 = arith.mulf %107, %112 : vector<8x8xf32>
    %c0_97 = arith.constant 0 : index
    %c4 = arith.constant 4 : index
    %c0_98 = arith.constant 0 : index
    %c0_99 = arith.constant 0 : index
    %114 = vector.load %arg4[%c0_97, %c4, %c0_98, %c0_99] : memref<1x8x8x8xf32, #tpu.memory_space<vmem>>, vector<1x1x8x8xf32>
    %115 = vector.shape_cast %114 : vector<1x1x8x8xf32> to vector<8x8xf32>
    %116 = vector.shape_cast %113 : vector<8x8xf32> to vector<1x1x8x8xf32>
    tpu.vector_store %arg4[%c0_97, %c4, %c0_98, %c0_99], %116 {strides = array<i32>} : memref<1x8x8x8xf32, #tpu.memory_space<vmem>>, vector<1x1x8x8xf32>,
    %cst_100 = arith.constant dense<0.000000e+00> : vector<8x8xf32>
    %117 = tpu.matmul %113, %101, %cst_100 {dimension_numbers = #tpu.dot_dimension_numbers<[1], [0], [0], [1], [0, 0, 1, 1], [], []>} : vector<8x8xf32>, vector<8x8xf32>, vector<8x8xf32> -> vector<8x8xf32>
    %c0_101 = arith.constant 0 : index
    %c0_102 = arith.constant 0 : index
    %c0_103 = arith.constant 0 : index
    %c40 = arith.constant 40 : index
    %118 = vector.load %arg2[%c0_101, %c0_102, %c0_103, %c40] : memref<1x8x3x64xf32, #tpu.memory_space<vmem>>, vector<1x8x1x8xf32>
    %119 = vector.shape_cast %118 : vector<1x8x1x8xf32> to vector<8x8xf32>
    %c0_104 = arith.constant 0 : index
    %c0_105 = arith.constant 0 : index
    %c1_106 = arith.constant 1 : index
    %c40_107 = arith.constant 40 : index
    %120 = vector.load %arg2[%c0_104, %c0_105, %c1_106, %c40_107] : memref<1x8x3x64xf32, #tpu.memory_space<vmem>>, vector<1x8x1x8xf32>
    %121 = vector.shape_cast %120 : vector<1x8x1x8xf32> to vector<8x8xf32>
    %c0_108 = arith.constant 0 : index
    %c0_109 = arith.constant 0 : index
    %c2_110 = arith.constant 2 : index
    %c40_111 = arith.constant 40 : index
    %122 = vector.load %arg2[%c0_108, %c0_109, %c2_110, %c40_111] : memref<1x8x3x64xf32, #tpu.memory_space<vmem>>, vector<1x8x1x8xf32>
    %123 = vector.shape_cast %122 : vector<1x8x1x8xf32> to vector<8x8xf32>
    %cst_112 = arith.constant dense<0.000000e+00> : vector<8x8xf32>
    %124 = tpu.matmul %119, %121, %cst_112 {dimension_numbers = #tpu.dot_dimension_numbers<[1], [1], [0], [0], [0, 0, 1, 0], [], []>} : vector<8x8xf32>, vector<8x8xf32>, vector<8x8xf32> -> vector<8x8xf32>
    %cst_113 = arith.constant dense<0xFF800000> : vector<8xf32>
    %125 = vector.multi_reduction <maximumf>, %124, %cst_113 [1] : vector<8x8xf32> to vector<8xf32>
    %126 = vector.shape_cast %125 : vector<8xf32> to vector<8x1xf32>
    %127 = vector.broadcast %126 : vector<8x1xf32> to vector<8x8xf32>
    %128 = arith.subf %124, %127 : vector<8x8xf32>
    %129 = math.exp %128 : vector<8x8xf32>
    %cst_114 = arith.constant dense<0.000000e+00> : vector<8xf32>
    %130 = vector.multi_reduction <add>, %129, %cst_114 [1] : vector<8x8xf32> to vector<8xf32>
    %131 = vector.shape_cast %130 : vector<8xf32> to vector<8x1xf32>
    %cst_115 = arith.constant 1.000000e+00 : f32
    %132 = vector.broadcast %cst_115 : f32 to vector<8x1xf32>
    %133 = arith.divf %132, %131 : vector<8x1xf32>
    %134 = vector.broadcast %133 : vector<8x1xf32> to vector<8x8xf32>
    %135 = arith.mulf %129, %134 : vector<8x8xf32>
    %c0_116 = arith.constant 0 : index
    %c5 = arith.constant 5 : index
    %c0_117 = arith.constant 0 : index
    %c0_118 = arith.constant 0 : index
    %136 = vector.load %arg4[%c0_116, %c5, %c0_117, %c0_118] : memref<1x8x8x8xf32, #tpu.memory_space<vmem>>, vector<1x1x8x8xf32>
    %137 = vector.shape_cast %136 : vector<1x1x8x8xf32> to vector<8x8xf32>
    %138 = vector.shape_cast %135 : vector<8x8xf32> to vector<1x1x8x8xf32>
    tpu.vector_store %arg4[%c0_116, %c5, %c0_117, %c0_118], %138 {strides = array<i32>} : memref<1x8x8x8xf32, #tpu.memory_space<vmem>>, vector<1x1x8x8xf32>,
    %cst_119 = arith.constant dense<0.000000e+00> : vector<8x8xf32>
    %139 = tpu.matmul %135, %123, %cst_119 {dimension_numbers = #tpu.dot_dimension_numbers<[1], [0], [0], [1], [0, 0, 1, 1], [], []>} : vector<8x8xf32>, vector<8x8xf32>, vector<8x8xf32> -> vector<8x8xf32>
    %140 = tpu.concatenate %117, %139 in 1 : vector<8x8xf32>, vector<8x8xf32> -> vector<8x16xf32>
    %c0_120 = arith.constant 0 : index
    %c0_121 = arith.constant 0 : index
    %c32_122 = arith.constant 32 : index
    %141 = vector.load %arg3[%c0_120, %c0_121, %c32_122] : memref<1x8x64xf32, #tpu.memory_space<vmem>>, vector<1x8x16xf32>
    %142 = vector.shape_cast %141 : vector<1x8x16xf32> to vector<8x16xf32>
    %143 = vector.shape_cast %140 : vector<8x16xf32> to vector<1x8x16xf32>
    tpu.vector_store %arg3[%c0_120, %c0_121, %c32_122], %143 {strides = array<i32>} : memref<1x8x64xf32, #tpu.memory_space<vmem>>, vector<1x8x16xf32>,
    %c0_123 = arith.constant 0 : index
    %c0_124 = arith.constant 0 : index
    %c0_125 = arith.constant 0 : index
    %c48 = arith.constant 48 : index
    %144 = vector.load %arg2[%c0_123, %c0_124, %c0_125, %c48] : memref<1x8x3x64xf32, #tpu.memory_space<vmem>>, vector<1x8x1x8xf32>
    %145 = vector.shape_cast %144 : vector<1x8x1x8xf32> to vector<8x8xf32>
    %c0_126 = arith.constant 0 : index
    %c0_127 = arith.constant 0 : index
    %c1_128 = arith.constant 1 : index
    %c48_129 = arith.constant 48 : index
    %146 = vector.load %arg2[%c0_126, %c0_127, %c1_128, %c48_129] : memref<1x8x3x64xf32, #tpu.memory_space<vmem>>, vector<1x8x1x8xf32>
    %147 = vector.shape_cast %146 : vector<1x8x1x8xf32> to vector<8x8xf32>
    %c0_130 = arith.constant 0 : index
    %c0_131 = arith.constant 0 : index
    %c2_132 = arith.constant 2 : index
    %c48_133 = arith.constant 48 : index
    %148 = vector.load %arg2[%c0_130, %c0_131, %c2_132, %c48_133] : memref<1x8x3x64xf32, #tpu.memory_space<vmem>>, vector<1x8x1x8xf32>
    %149 = vector.shape_cast %148 : vector<1x8x1x8xf32> to vector<8x8xf32>
    %cst_134 = arith.constant dense<0.000000e+00> : vector<8x8xf32>
    %150 = tpu.matmul %145, %147, %cst_134 {dimension_numbers = #tpu.dot_dimension_numbers<[1], [1], [0], [0], [0, 0, 1, 0], [], []>} : vector<8x8xf32>, vector<8x8xf32>, vector<8x8xf32> -> vector<8x8xf32>
    %cst_135 = arith.constant dense<0xFF800000> : vector<8xf32>
    %151 = vector.multi_reduction <maximumf>, %150, %cst_135 [1] : vector<8x8xf32> to vector<8xf32>
    %152 = vector.shape_cast %151 : vector<8xf32> to vector<8x1xf32>
    %153 = vector.broadcast %152 : vector<8x1xf32> to vector<8x8xf32>
    %154 = arith.subf %150, %153 : vector<8x8xf32>
    %155 = math.exp %154 : vector<8x8xf32>
    %cst_136 = arith.constant dense<0.000000e+00> : vector<8xf32>
    %156 = vector.multi_reduction <add>, %155, %cst_136 [1] : vector<8x8xf32> to vector<8xf32>
    %157 = vector.shape_cast %156 : vector<8xf32> to vector<8x1xf32>
    %cst_137 = arith.constant 1.000000e+00 : f32
    %158 = vector.broadcast %cst_137 : f32 to vector<8x1xf32>
    %159 = arith.divf %158, %157 : vector<8x1xf32>
    %160 = vector.broadcast %159 : vector<8x1xf32> to vector<8x8xf32>
    %161 = arith.mulf %155, %160 : vector<8x8xf32>
    %c0_138 = arith.constant 0 : index
    %c6 = arith.constant 6 : index
    %c0_139 = arith.constant 0 : index
    %c0_140 = arith.constant 0 : index
    %162 = vector.load %arg4[%c0_138, %c6, %c0_139, %c0_140] : memref<1x8x8x8xf32, #tpu.memory_space<vmem>>, vector<1x1x8x8xf32>
    %163 = vector.shape_cast %162 : vector<1x1x8x8xf32> to vector<8x8xf32>
    %164 = vector.shape_cast %161 : vector<8x8xf32> to vector<1x1x8x8xf32>
    tpu.vector_store %arg4[%c0_138, %c6, %c0_139, %c0_140], %164 {strides = array<i32>} : memref<1x8x8x8xf32, #tpu.memory_space<vmem>>, vector<1x1x8x8xf32>,
    %cst_141 = arith.constant dense<0.000000e+00> : vector<8x8xf32>
    %165 = tpu.matmul %161, %149, %cst_141 {dimension_numbers = #tpu.dot_dimension_numbers<[1], [0], [0], [1], [0, 0, 1, 1], [], []>} : vector<8x8xf32>, vector<8x8xf32>, vector<8x8xf32> -> vector<8x8xf32>
    %c0_142 = arith.constant 0 : index
    %c0_143 = arith.constant 0 : index
    %c0_144 = arith.constant 0 : index
    %c56 = arith.constant 56 : index
    %166 = vector.load %arg2[%c0_142, %c0_143, %c0_144, %c56] : memref<1x8x3x64xf32, #tpu.memory_space<vmem>>, vector<1x8x1x8xf32>
    %167 = vector.shape_cast %166 : vector<1x8x1x8xf32> to vector<8x8xf32>
    %c0_145 = arith.constant 0 : index
    %c0_146 = arith.constant 0 : index
    %c1_147 = arith.constant 1 : index
    %c56_148 = arith.constant 56 : index
    %168 = vector.load %arg2[%c0_145, %c0_146, %c1_147, %c56_148] : memref<1x8x3x64xf32, #tpu.memory_space<vmem>>, vector<1x8x1x8xf32>
    %169 = vector.shape_cast %168 : vector<1x8x1x8xf32> to vector<8x8xf32>
    %c0_149 = arith.constant 0 : index
    %c0_150 = arith.constant 0 : index
    %c2_151 = arith.constant 2 : index
    %c56_152 = arith.constant 56 : index
    %170 = vector.load %arg2[%c0_149, %c0_150, %c2_151, %c56_152] : memref<1x8x3x64xf32, #tpu.memory_space<vmem>>, vector<1x8x1x8xf32>
    %171 = vector.shape_cast %170 : vector<1x8x1x8xf32> to vector<8x8xf32>
    %cst_153 = arith.constant dense<0.000000e+00> : vector<8x8xf32>
    %172 = tpu.matmul %167, %169, %cst_153 {dimension_numbers = #tpu.dot_dimension_numbers<[1], [1], [0], [0], [0, 0, 1, 0], [], []>} : vector<8x8xf32>, vector<8x8xf32>, vector<8x8xf32> -> vector<8x8xf32>
    %cst_154 = arith.constant dense<0xFF800000> : vector<8xf32>
    %173 = vector.multi_reduction <maximumf>, %172, %cst_154 [1] : vector<8x8xf32> to vector<8xf32>
    %174 = vector.shape_cast %173 : vector<8xf32> to vector<8x1xf32>
    %175 = vector.broadcast %174 : vector<8x1xf32> to vector<8x8xf32>
    %176 = arith.subf %172, %175 : vector<8x8xf32>
    %177 = math.exp %176 : vector<8x8xf32>
    %cst_155 = arith.constant dense<0.000000e+00> : vector<8xf32>
    %178 = vector.multi_reduction <add>, %177, %cst_155 [1] : vector<8x8xf32> to vector<8xf32>
    %179 = vector.shape_cast %178 : vector<8xf32> to vector<8x1xf32>
    %cst_156 = arith.constant 1.000000e+00 : f32
    %180 = vector.broadcast %cst_156 : f32 to vector<8x1xf32>
    %181 = arith.divf %180, %179 : vector<8x1xf32>
    %182 = vector.broadcast %181 : vector<8x1xf32> to vector<8x8xf32>
    %183 = arith.mulf %177, %182 : vector<8x8xf32>
    %c0_157 = arith.constant 0 : index
    %c7 = arith.constant 7 : index
    %c0_158 = arith.constant 0 : index
    %c0_159 = arith.constant 0 : index
    %184 = vector.load %arg4[%c0_157, %c7, %c0_158, %c0_159] : memref<1x8x8x8xf32, #tpu.memory_space<vmem>>, vector<1x1x8x8xf32>
    %185 = vector.shape_cast %184 : vector<1x1x8x8xf32> to vector<8x8xf32>
    %186 = vector.shape_cast %183 : vector<8x8xf32> to vector<1x1x8x8xf32>
    tpu.vector_store %arg4[%c0_157, %c7, %c0_158, %c0_159], %186 {strides = array<i32>} : memref<1x8x8x8xf32, #tpu.memory_space<vmem>>, vector<1x1x8x8xf32>,
    %cst_160 = arith.constant dense<0.000000e+00> : vector<8x8xf32>
    %187 = tpu.matmul %183, %171, %cst_160 {dimension_numbers = #tpu.dot_dimension_numbers<[1], [0], [0], [1], [0, 0, 1, 1], [], []>} : vector<8x8xf32>, vector<8x8xf32>, vector<8x8xf32> -> vector<8x8xf32>
    %188 = tpu.concatenate %165, %187 in 1 : vector<8x8xf32>, vector<8x8xf32> -> vector<8x16xf32>
    %c0_161 = arith.constant 0 : index
    %c0_162 = arith.constant 0 : index
    %c48_163 = arith.constant 48 : index
    %189 = vector.load %arg3[%c0_161, %c0_162, %c48_163] : memref<1x8x64xf32, #tpu.memory_space<vmem>>, vector<1x8x16xf32>
    %190 = vector.shape_cast %189 : vector<1x8x16xf32> to vector<8x16xf32>
    %191 = vector.shape_cast %188 : vector<8x16xf32> to vector<1x8x16xf32>
    tpu.vector_store %arg3[%c0_161, %c0_162, %c48_163], %191 {strides = array<i32>} : memref<1x8x64xf32, #tpu.memory_space<vmem>>, vector<1x8x16xf32>,
    return
  }
  func.func @transform_0(%arg0: i32, %arg1: i32) -> (i32, i32, i32, i32) {
    %c0_i32 = arith.constant 0 : i32
    %c0_i32_0 = arith.constant 0 : i32
    %c0_i32_1 = arith.constant 0 : i32
    return %arg0, %c0_i32, %c0_i32_0, %arg1 : i32, i32, i32, i32
  }
  func.func @transform_1(%arg0: i32, %arg1: i32) -> (i32, i32, i32) {
    %c0_i32 = arith.constant 0 : i32
    %c0_i32_0 = arith.constant 0 : i32
    return %arg0, %c0_i32, %arg1 : i32, i32, i32
  }
  func.func @transform_2(%arg0: i32, %arg1: i32) -> (i32, i32, i32, i32) {
    %c0_i32 = arith.constant 0 : i32
    %c0_i32_0 = arith.constant 0 : i32
    %c0_i32_1 = arith.constant 0 : i32
    return %arg0, %arg1, %c0_i32, %c0_i32_0 : i32, i32, i32, i32
  }
}

</mosaic_0001>

<bundles_post_ra>
// kernel: attention_forward.3
= control target key start
LH: loop header
LB: loop body
LE: loop exit
PB: predicated region body
PF: predicated region fallthrough
CT: control target
= control target key end

     0   :  { %7 = vsyncpa [#allocation4], 0  ;;  %s281_s0 = inlined_call_operand.hbm [shape: f32[16,64], index: 0, kind: input, shape index: {}]   ;;  %s282_s1 = inlined_call_operand.hbm [shape: f32[64,192], index: 1, kind: input, shape index: {}]   ;;  %s283_s2 = inlined_call_operand.vmem [shape: f32[16,192], index: 2, kind: output, shape index: {}]  }
   0x1   :  { %s13_s11 = sshll.u32 %s281_s0, 4  ;;  %s14_s11 = int_to_ptr.hbm [resolvable:$true] %s13_s11 }
   0x2   :  { %8 = vsyncpa [#allocation6], 0  ;;  %s231_s12 = smov [#allocation3]   ;;  %s26_s16 = sshll.u32 %s282_s1, 4  ;;  %s27_s16 = int_to_ptr.hbm [resolvable:$true] %s26_s16 }
   0x3   :  { %s15_s13 = sshll.u32 %s231_s12, 4  ;;  %s232_s17 = smov 128   ;;  %s16_s13 = int_to_ptr.vmem [resolvable:$true] %s15_s13 }
   0x4   :  { %s233_s18 = smov 8   ;;  %s234_s19 = smov [#allocation5]  }
   0x5   :  { %21 = dma.hbm_to_vmem [thread:$0]  %s14_s11, 256, %s16_s13, [#allocation4], %s232_s17, %s232_s17, %s233_s18  }
   0x6   :  { %s28_s20 = sshll.u32 %s234_s19, 4  ;;  %s235_s21 = smov 256   ;;  %s29_s20 = int_to_ptr.vmem [resolvable:$true] %s28_s20 }
   0x7   :  { %s236_s22 = smov 16  }
   0x8   :  { %34 = dma.hbm_to_vmem [thread:$0]  %s27_s16, 2048, %s29_s20, [#allocation6], %s235_s21, %s235_s21, %s236_s22  }
   0x9   :  { %227 = dma.done.wait [#allocation4], 256  }
   0xa   :  { %228 = vsyncadd [#allocation4], 4294967040 }
   0xb   :  { %229 = dma.done.wait [#allocation6], 2048  }
   0xc   :  { %230 = vsyncadd [#allocation6], 4294965248  ;;  %vm48_vm0 = vcmask 523264   ;;  %v237_v0 = vmov 0.0   ;;  %v72_v1 = vld [vmem:[#allocation5 + $0x70] sm:$0xff]  ;;  %v73_v2 = vld [vmem:[#allocation5 + $0x78] sm:$0xff] }
   0xd   :  { %49 = vst.msk [vmem:[#allocation2 + $0x8] sm:$0xff] %vm48_vm0, %v237_v0  ;;  %v70_v3 = vld [vmem:[#allocation5 + $0x60] sm:$0xff]  ;;  %156 = vmatpush.msra.mxu2 %v72_v1  ;;  %164 = vmatpush.msra.mxu3 %v73_v2  ;;  %v71_v4 = vld [vmem:[#allocation5 + $0x68] sm:$0xff]  ;;  %v68_v5 = vld [vmem:[#allocation5 + $0x50] sm:$0xff] }
   0xe   :  { %51 = vst.msk [vmem:[#allocation2 + $0x18] sm:$0xff] %vm48_vm0, %v237_v0  ;;  %v69_v6 = vld [vmem:[#allocation5 + $0x58] sm:$0xff]  ;;  %89 = vmatpush.msra.mxu0 %v72_v1  ;;  %112 = vmatpush.msra.mxu1 %v73_v2  ;;  %v66_v7 = vld [vmem:[#allocation5 + $0x40] sm:$0xff]  ;;  %v67_v8 = vld [vmem:[#allocation5 + $0x48] sm:$0xff] }
   0xf   :  { %157 = vmatpush.msra.mxu2 %v70_v3  ;;  %165 = vmatpush.msra.mxu3 %v71_v4  ;;  %v64_v9 = vld [vmem:[#allocation5 + $0x30] sm:$0xff]  ;;  %v65_v10 = vld [vmem:[#allocation5 + $0x38] sm:$0xff]  ;;  %v62_v11 = vld [vmem:[#allocation5 + $0x20] sm:$0xff] }
  0x10   :  { %90 = vmatpush.msra.mxu0 %v70_v3  ;;  %113 = vmatpush.msra.mxu1 %v71_v4  ;;  %v63_v12 = vld [vmem:[#allocation5 + $0x28] sm:$0xff]  ;;  %v60_v13 = vld [vmem:[#allocation5 + $0x10] sm:$0xff]  ;;  %v61_v14 = vld [vmem:[#allocation5 + $0x18] sm:$0xff] }
  0x11   :  { %158 = vmatpush.msra.mxu2 %v68_v5  ;;  %166 = vmatpush.msra.mxu3 %v69_v6  ;;  %v58_v15 = vld [vmem:[#allocation5] sm:$0xff]  ;;  %v59_v16 = vld [vmem:[#allocation5 + $0x8] sm:$0xff]  ;;  %v57_v17 = vld [vmem:[#allocation3 + $0x8] sm:$0xff] }
  0x12   :  { %91 = vmatpush.msra.mxu0 %v68_v5  ;;  %114 = vmatpush.msra.mxu1 %v69_v6  ;;  %v56_v18 = vld [vmem:[#allocation3] sm:$0xff] }
  0x13   :  { %159 = vmatpush.msra.mxu2 %v66_v7  ;;  %167 = vmatpush.msra.mxu3 %v67_v8 }
  0x14   :  { %92 = vmatpush.msra.mxu0 %v66_v7  ;;  %115 = vmatpush.msra.mxu1 %v67_v8  ;;  %v53_v19 = vld [vmem:[#allocation2 + $0x8] sm:$0xff] }
  0x15   :  { %160 = vmatpush.msra.mxu2 %v64_v9  ;;  %168 = vmatpush.msra.mxu3 %v65_v10  ;;  %v55_v23 = vld [vmem:[#allocation2 + $0x18] sm:$0xff] }
  0x16   :  { %93 = vmatpush.msra.mxu0 %v64_v9  ;;  %116 = vmatpush.msra.mxu1 %v65_v10 }
  0x17   :  { %161 = vmatpush.msra.mxu2 %v62_v11  ;;  %169 = vmatpush.msra.mxu3 %v63_v12 }
  0x18   :  { %94 = vmatpush.msra.mxu0 %v62_v11  ;;  %117 = vmatpush.msra.mxu1 %v63_v12 }
  0x19   :  { %162 = vmatpush.msra.mxu2 %v60_v13  ;;  %170 = vmatpush.msra.mxu3 %v61_v14 }
  0x1a   :  { %95 = vmatpush.msra.mxu0 %v60_v13  ;;  %118 = vmatpush.msra.mxu1 %v61_v14 }
  0x1b   :  { %163 = vmatpush.msra.mxu2 %v58_v15  ;;  %171 = vmatpush.msra.mxu3 %v59_v16 }
  0x1c   :  { %153 = vmatmul.msk.f32.vlgmr.msra.gmra.mxu2 %vm48_vm0, %v57_v17  ;;  %155 = vmatmul.msk.f32.vlgmr.msra.gmra.mxu3 %vm48_vm0, %v57_v17 }
  0x1d   :  { %96 = vmatpush.msra.mxu0 %v58_v15  ;;  %119 = vmatpush.msra.mxu1 %v59_v16 }
  0x1e   :  { %152 = vmatmul.msk.f32.vlgmr.msra.gmra.mxu0 %vm48_vm0, %v56_v18  ;;  %154 = vmatmul.msk.f32.vlgmr.msra.gmra.mxu1 %vm48_vm0, %v56_v18 }
  0x9b   :  { %v98_v20 = vpop.f32.mrf.mxu0  ;;  %v121_v21 = vpop.f32.mrf.mxu1 }
  0x9c   :  { %v128_v22 = vadd.f32 %v121_v21, %v53_v19  ;;  %142 = vst [vmem:[%s283_s2] sm:$0xff] %v98_v20 }
  0x9e   :  { %132 = vst.msk [vmem:[#allocation2 + $0x8] sm:$0xff] %vm48_vm0, %v128_v22 }
  0x9f   :  { %v101_v24 = vpop.f32.mrf.mxu2  ;;  %v124_v25 = vpop.f32.mrf.mxu3 }
  0xa0   :  { %v130_v26 = vadd.f32 %v124_v25, %v55_v23  ;;  %144 = vst [vmem:[%s283_s2 + $0x10] sm:$0xff] %v101_v24 }
  0xa2   :  { %134 = vst.msk [vmem:[#allocation2 + $0x18] sm:$0xff] %vm48_vm0, %v130_v26 }
  0xa5   :  { %v139_v27 = vld [vmem:[#allocation2 + $0x8] sm:$0xff] }
  0xa6   :  { %143 = vst.msk [vmem:[%s283_s2 + $0x8] sm:$0xff] %vm48_vm0, %v139_v27 }
  0xa9   :  { %v141_v28 = vld [vmem:[#allocation2 + $0x18] sm:$0xff] }
  0xaa   :  { %145 = vst.msk [vmem:[%s283_s2 + $0x18] sm:$0xff] %vm48_vm0, %v141_v28 }
  0xab   :  { %150 = vsyncpa [#allocation4], 1 }
  0xac   :  { %151 = vsyncpa [#allocation6], 1 }

// kernel: attention_forward.5
= control target key start
LH: loop header
LB: loop body
LE: loop exit
PB: predicated region body
PF: predicated region fallthrough
CT: control target
= control target key end

     0   :  { %vm19_vm0 = vcmask 523264   ;;  %v140_v2 = vmov 0.0   ;;  %s208_s0 = inlined_call_operand.vmem [shape: f32[16,64], index: 0, kind: input, shape index: {}]   ;;  %s209_s1 = inlined_call_operand.vmem [shape: f32[64,64], index: 1, kind: input, shape index: {}]   ;;  %s210_s2 = inlined_call_operand.vmem [shape: f32[1,64], index: 2, kind: input, shape index: {}]   ;;  %s211_s3 = inlined_call_operand.hbm [shape: f32[16,64], index: 3, kind: output, shape index: {}]  }
   0x1   :  { %v33_v0 = vld [vmem:[%s209_s1 + $0x38] sm:$0xff]  ;;  %v32_v1 = vld [vmem:[%s209_s1 + $0x30] sm:$0xff]  ;;  %20 = vst.msk [vmem:[#allocation2] sm:$0xff] %vm19_vm0, %v140_v2  ;;  %v31_v3 = vld [vmem:[%s209_s1 + $0x28] sm:$0xff] }
   0x2   :  { %49 = vmatpush.msra.mxu0 %v33_v0  ;;  %101 = vmatpush.msra.mxu1 %v33_v0  ;;  %21 = vst.msk [vmem:[#allocation2 + $0x8] sm:$0xff] %vm19_vm0, %v140_v2 }
   0x4   :  { %50 = vmatpush.msra.mxu0 %v32_v1  ;;  %102 = vmatpush.msra.mxu1 %v32_v1 }
   0x5   :  { %8 = vsyncpa [#allocation4], 0  ;;  %v30_v4 = vld [vmem:[%s209_s1 + $0x20] sm:$0xff]  ;;  %v29_v5 = vld [vmem:[%s209_s1 + $0x18] sm:$0xff]  ;;  %s87_s9 = sshll.u32 %s211_s3, 4  ;;  %s142_s10 = smov 128   ;;  %s88_s9 = int_to_ptr.hbm [resolvable:$true] %s87_s9 }
   0x6   :  { %51 = vmatpush.msra.mxu0 %v31_v3  ;;  %103 = vmatpush.msra.mxu1 %v31_v3  ;;  %v28_v6 = vld [vmem:[%s209_s1 + $0x10] sm:$0xff]  ;;  %v27_v7 = vld [vmem:[%s209_s1 + $0x8] sm:$0xff]  ;;  %v26_v8 = vld [vmem:[%s209_s1] sm:$0xff]  ;;  %s143_s11 = smov 8  }
   0x7   :  { %v24_v9 = vld [vmem:[%s208_s0] sm:$0xff]  ;;  %v25_v10 = vld [vmem:[%s208_s0 + $0x8] sm:$0xff]  ;;  %s141_s0 = smov [#allocation3]  }
   0x8   :  { %52 = vmatpush.msra.mxu0 %v30_v4  ;;  %104 = vmatpush.msra.mxu1 %v30_v4  ;;  %v22_v11 = vld [vmem:[#allocation2] sm:$0xff]  ;;  %s85_s6 = sshll.u32 %s141_s0, 4  ;;  %s86_s6 = int_to_ptr.vmem [resolvable:$true] %s85_s6 }
   0x9   :  { %v23_v12 = vld [vmem:[#allocation2 + $0x8] sm:$0xff]  ;;  %v113_v17 = vld [vmem:[%s210_s2] ss:$0 sm:$0xff] }
   0xa   :  { %53 = vmatpush.msra.mxu0 %v29_v5  ;;  %105 = vmatpush.msra.mxu1 %v29_v5 }
   0xc   :  { %54 = vmatpush.msra.mxu0 %v28_v6  ;;  %106 = vmatpush.msra.mxu1 %v28_v6 }
   0xe   :  { %55 = vmatpush.msra.mxu0 %v27_v7  ;;  %107 = vmatpush.msra.mxu1 %v27_v7 }
  0x10   :  { %56 = vmatpush.msra.mxu0 %v26_v8  ;;  %108 = vmatpush.msra.mxu1 %v26_v8 }
  0x11   :  { %99 = vmatmul.msk.f32.vlgmr.msra.gmra.mxu0 %vm19_vm0, %v24_v9  ;;  %100 = vmatmul.msk.f32.vlgmr.msra.gmra.mxu1 %vm19_vm0, %v25_v10 }
  0x8e   :  { %v58_v13 = vpop.f32.mrf.mxu0  ;;  %v61_v14 = vpop.f32.mrf.mxu1 }
  0x8f   :  { %v64_v15 = vadd.f32 %v58_v13, %v22_v11  ;;  %v65_v16 = vadd.f32 %v61_v14, %v23_v12 }
  0x91   :  { %66 = vst.msk [vmem:[#allocation2] sm:$0xff] %vm19_vm0, %v64_v15 }
  0x92   :  { %67 = vst.msk [vmem:[#allocation2 + $0x8] sm:$0xff] %vm19_vm0, %v65_v16 }
  0x98   :  { %v71_v18 = vld [vmem:[#allocation2] sm:$0xff] }
  0x99   :  { %v72_v19 = vld [vmem:[#allocation2 + $0x8] sm:$0xff]  ;;  %v77_v20 = vadd.f32 %v113_v17, %v71_v18 }
  0x9a   :  { %v78_v21 = vadd.f32 %v113_v17, %v72_v19 }
  0x9b   :  { %79 = vst.msk [vmem:[#allocation3] sm:$0xff] %vm19_vm0, %v77_v20 }
  0x9c   :  { %80 = vst.msk [vmem:[#allocation3 + $0x8] sm:$0xff] %vm19_vm0, %v78_v21 }
  0x9d   :  { %93 = dma.vmem_to_hbm [thread:$0]  %s86_s6, 256, %s88_s9, [#allocation4], %s142_s10, %s142_s10, %s143_s11  }
  0x9e   :  { %138 = dma.done.wait [#allocation4], 256  }
  0x9f   :  { %139 = vsyncadd [#allocation4], 4294967040 }
  0xa0   :  { %98 = vsyncpa [#allocation4], 1 }

// kernel: attention_forward.4
= control target key start
LH: loop header
LB: loop body
LE: loop exit
PB: predicated region body
PF: predicated region fallthrough
CT: control target
= control target key end

     0   :  { %8 = vsyncpa [#allocation3], 0  ;;  %s2632_s0 = inlined_call_operand.vmem [shape: f32[2,8,3,64], index: 0, kind: input, shape index: {}]   ;;  %s2633_s1 = inlined_call_operand.vmem [shape: f32[2,8,64], index: 1, kind: output, shape index: {0}]   ;;  %s2634_s2 = inlined_call_operand.hbm [shape: f32[2,8,8,8], index: 2, kind: output, shape index: {1}]  }
   0x1   :  { %10 = vsyncpa [#allocation3 + $0x1], 0  ;;  %s1987_s9 = smov 0   ;;  %s1989_s10 = smov 0  }
   0x2   :  { %s1991_s11 = smov 0   ;;  %s1993_s12 = smov 0  }
   0x3   :  { %s1995_s13 = smov 0   ;;  %s1997_s14 = smov 0  }
   0x4 LB: > { %s1734_s15 = sadd.s32 4294967295, %s1958_s14   ;;  %s1735_s16 = sadd.s32 4294967294, %s1958_s14   ;;  %s1958_s14 = sphi %s1997_s14, %s16_s14   ;;  %s1954_s13 = sphi %s1995_s13, %s2641_s13   ;;  %s1950_s12 = sphi %s1993_s12, %s2640_s12   ;;  %s1946_s11 = sphi %s1991_s11, %s2639_s11   ;;  %s1942_s10 = sphi %s1989_s10, %s2638_s10   ;;  %s1938_s9 = sphi %s1987_s9, %s2637_s9  }
   0x5   : > { %s28_s17 = sadd.s32 1, %s1954_s13  ;;  %s93_s18 = sadd.s32 1, %s1946_s11 }
   0x6   : > { %p30_p0 = scmp.ge.s32.totalorder %s28_s17, 2  ;;  %p103_p1 = scmp.ne.s32.totalorder %s1946_s11, %s1942_s10 }
   0x7   : > { %p104_p2 = scmp.eq.s32.totalorder %s1734_s15, 1  ;;  %p109_p3 = scmp.ne.s32.totalorder %s1942_s10, %s1938_s9 }
   0x8   : > { %s2643_s17 = smov (%p30_p0, %s28_s17), 0  ;;  %p110_p5 = scmp.eq.s32.totalorder %s1735_s16, 1 }
   0x9   : > { %p2027_p4 = por %p104_p2, %p103_p1  ;;  %s88_s20 = ssub.s32 %s1954_s13, %s2643_s17 }
   0xa   : > { %p1738_p6 = scmp.ge.s32.totalorder %s1958_s14, 1  ;;  %p91_p7 = scmp.eq.s32.totalorder %s88_s20, 0 }
   0xb   : > { %p2034_p8 = por %p110_p5, %p109_p3  ;;  %p139_p9 = scmp.lt.s32.totalorder %s1958_s14, 3 }
   0xc   : > { %s2040_s22 = scalar_select %p91_p7, %s1946_s11, %s93_s18  }
   0xd   : > { %p140_p10 = pnand %p1738_p6, %p139_p9 }
   0xe   : > { %p171_p11 = scmp.lt.s32.totalorder (!%p140_p10), %s1950_s12, 1  ;;  %s1960_s28 = smov (!%p140_p10), 104  }
   0xf   : > { %143 = sbr.rel (%p140_p10) target bundleno = 1110 (0x456), region = 24  ;;  %s1961_s29 = smov (!%p140_p10), 88  }
  0x10   : > { %s1962_s30 = smov (!%p140_p10), 72   ;;  %s1963_s3 = smov (!%p140_p10), 120  }
  0x11   : > { %s1964_s4 = smov (!%p140_p10), 112   ;;  %s1965_s5 = smov (!%p140_p10), 96  }
  0x12   : > { %s1966_s6 = smov (!%p140_p10), 80   ;;  %s168_s7 = sand.u32 (!%p140_p10), 1, %s1942_s10  }
  0x13   : > { %s1739_s8 = sshll.u32 (!%p140_p10), %s168_s7, 6  ;;  %s1967_s16 = smov (!%p140_p10), 8  }
  0x14   : > { %s2044_s23 = scalar_select %p171_p11, %s1950_s12, 1  ;;  %vm220_vm0 = vcmask 1041409   ;;  %vm223_vm1 = vcmask 1042434   ;;  %vm226_vm2 = vcmask 1043459   ;;  %vm229_vm3 = vcmask 1044484  }
  0x15   : > { %vm232_vm4 = vcmask 1045509   ;;  %vm235_vm5 = vcmask 1046534   ;;  %vm238_vm6 = vcmask 1047559   ;;  %vm262_vm7 = vcmask 64512   ;;  %s2354_s15 = scalar_lea.vmem [#allocation2], %s1739_s8  ;;  %s1968_s20 = smov 16  }
  0x16   : > { %s1779_s24 = sshll.u32 %s2044_s23, 5  ;;  %s1742_s18 = sshll.u32 %s2044_s23, 3 }
  0x17   : > { %s2050_s27 = scalar_lea.vmem %s2632_s0, %s1779_s24  ;;  %s1780_s24 = sshll.u32 %s1950_s12, 6 }
  0x18   : > { %v195_v0 = vld [vmem:[%s2050_s27 + $0x1] sm:$0x1]  ;;  %v196_v1 = vld [vmem:[%s2050_s27 + $0x5] sm:$0x1]  ;;  %v197_v2 = vld [vmem:[%s2050_s27 + $0x9] sm:$0x1] }
  0x19   : > { %v198_v3 = vld [vmem:[%s2050_s27 + $0xd] sm:$0x1]  ;;  %v199_v4 = vld [vmem:[%s2050_s27 + $0x11] sm:$0x1]  ;;  %v200_v5 = vld [vmem:[%s2050_s27 + $0x15] sm:$0x1] }
  0x1a   : > { %v201_v6 = vld [vmem:[%s2050_s27 + $0x19] sm:$0x1]  ;;  %v248_v7 = vrot.slane %v196_v1, 7  ;;  %v250_v8 = vrot.slane %v197_v2, 6  ;;  %v202_v9 = vld [vmem:[%s2050_s27 + $0x1d] sm:$0x1] }
  0x1b   : > { %v252_v10 = vrot.slane %v198_v3, 5  ;;  %v254_v11 = vrot.slane %v199_v4, 4  ;;  %v256_v12 = vrot.slane %v200_v5, 3  ;;  %v258_v13 = vrot.slane %v201_v6, 2  ;;  %v187_v15 = vld [vmem:[%s2050_s27] sm:$0x1] }
  0x1c   : > { %v249_v14 = vsel %vm220_vm0, %v248_v7, %v195_v0  ;;  %v188_v16 = vld [vmem:[%s2050_s27 + $0x4] sm:$0x1]  ;;  %v189_v17 = vld [vmem:[%s2050_s27 + $0x8] sm:$0x1]  ;;  %v190_v19 = vld [vmem:[%s2050_s27 + $0xc] sm:$0x1] }
  0x1d   : > { %v251_v18 = vsel %vm223_vm1, %v250_v8, %v249_v14  ;;  %v191_v20 = vld [vmem:[%s2050_s27 + $0x10] sm:$0x1]  ;;  %v192_v21 = vld [vmem:[%s2050_s27 + $0x14] sm:$0x1]  ;;  %v260_v23 = vrot.slane %v202_v9, 1  ;;  %v219_v25 = vrot.slane %v188_v16, 7 }
  0x1e   : > { %v253_v22 = vsel %vm226_vm2, %v252_v10, %v251_v18  ;;  %v193_v24 = vld [vmem:[%s2050_s27 + $0x18] sm:$0x1]  ;;  %v222_v26 = vrot.slane %v189_v17, 6  ;;  %v194_v28 = vld [vmem:[%s2050_s27 + $0x1c] sm:$0x1]  ;;  %v225_v29 = vrot.slane %v190_v19, 5 }
  0x1f   : > { %v255_v27 = vsel %vm229_vm3, %v254_v11, %v253_v22  ;;  %v228_v30 = vrot.slane %v191_v20, 4  ;;  %v221_v32 = vsel %vm220_vm0, %v219_v25, %v187_v15  ;;  %v231_v33 = vrot.slane %v192_v21, 3  ;;  %v709_v44 = vld [vmem:[%s2050_s27 + $0x4] sm:$0x1]  ;;  %v710_v45 = vld [vmem:[%s2050_s27 + $0x8] sm:$0x1] }
  0x20   : > { %v257_v31 = vsel %vm232_vm4, %v256_v12, %v255_v27  ;;  %v224_v35 = vsel %vm223_vm1, %v222_v26, %v221_v32  ;;  %v234_v36 = vrot.slane %v193_v24, 2  ;;  %v237_v39 = vrot.slane %v194_v28, 1  ;;  %v708_v47 = vld [vmem:[%s2050_s27] sm:$0x1]  ;;  %v711_v48 = vld [vmem:[%s2050_s27 + $0xc] sm:$0x1] }
  0x21   : > { %v259_v34 = vsel %vm235_vm5, %v258_v13, %v257_v31  ;;  %v227_v38 = vsel %vm226_vm2, %v225_v29, %v224_v35  ;;  %v740_v46 = vrot.slane %v709_v44, 7  ;;  %v742_v49 = vrot.slane %v710_v45, 6  ;;  %v712_v50 = vld [vmem:[%s2050_s27 + $0x10] sm:$0x1]  ;;  %v713_v53 = vld [vmem:[%s2050_s27 + $0x14] sm:$0x1] }
  0x22   : > { %v261_v37 = vsel %vm238_vm6, %v260_v23, %v259_v34  ;;  %v230_v40 = vsel %vm229_vm3, %v228_v30, %v227_v38  ;;  %v744_v52 = vrot.slane %v711_v48, 5  ;;  %v746_v55 = vrot.slane %v712_v50, 4  ;;  %v714_v56 = vld [vmem:[%s2050_s27 + $0x18] sm:$0x1]  ;;  %v715_v59 = vld [vmem:[%s2050_s27 + $0x1c] sm:$0x1] }
  0x23   : > { %1743 = vmatpush.xpose.msk.msra.mxu0 %vm262_vm7, %v261_v37  ;;  %v233_v41 = vsel %vm232_vm4, %v231_v33, %v230_v40  ;;  %v741_v51 = vsel %vm220_vm0, %v740_v46, %v708_v47  ;;  %v748_v58 = vrot.slane %v713_v53, 3  ;;  %v750_v61 = vrot.slane %v714_v56, 2  ;;  %v1070_v1 = vld [vmem:[%s2050_s27 + $0x5] sm:$0x1]  ;;  %v1071_v3 = vld [vmem:[%s2050_s27 + $0x9] sm:$0x1] }
  0x24   : > { %v236_v42 = vsel %vm235_vm5, %v234_v36, %v233_v41  ;;  %v743_v54 = vsel %vm223_vm1, %v742_v49, %v741_v51  ;;  %v752_v63 = vrot.slane %v715_v59, 1  ;;  %v1117_v4 = vrot.slane %v1070_v1, 7  ;;  %v1069_v5 = vld [vmem:[%s2050_s27 + $0x1] sm:$0x1]  ;;  %v1072_v6 = vld [vmem:[%s2050_s27 + $0xd] sm:$0x1] }
  0x25   : > { %v239_v43 = vsel %vm238_vm6, %v237_v39, %v236_v42  ;;  %v745_v57 = vsel %vm226_vm2, %v744_v52, %v743_v54  ;;  %v1119_v7 = vrot.slane %v1071_v3, 6  ;;  %v1073_v8 = vld [vmem:[%s2050_s27 + $0x11] sm:$0x1]  ;;  %v1074_v9 = vld [vmem:[%s2050_s27 + $0x15] sm:$0x1]  ;;  %v1121_v14 = vrot.slane %v1072_v6, 5 }
  0x26   : > { %1744 = vmatmul.msk.f32.vlgmr.msra.gmra.mxu0 %vm262_vm7, %v239_v43  ;;  %v747_v60 = vsel %vm229_vm3, %v746_v55, %v745_v57  ;;  %v1075_v10 = vld [vmem:[%s2050_s27 + $0x19] sm:$0x1]  ;;  %v1118_v11 = vsel %vm220_vm0, %v1117_v4, %v1069_v5  ;;  %v1076_v12 = vld [vmem:[%s2050_s27 + $0x1d] sm:$0x1]  ;;  %v1123_v15 = vrot.slane %v1073_v8, 4  ;;  %v1125_v16 = vrot.slane %v1074_v9, 3 }
  0x27   : > { %v749_v62 = vsel %vm232_vm4, %v748_v58, %v747_v60  ;;  %v1120_v13 = vsel %vm223_vm1, %v1119_v7, %v1118_v11  ;;  %v1127_v17 = vrot.slane %v1075_v10, 2  ;;  %v1129_v18 = vrot.slane %v1076_v12, 1  ;;  %v1423_v19 = vld [vmem:[%s2050_s27 + $0x5] sm:$0x1]  ;;  %v1424_v21 = vld [vmem:[%s2050_s27 + $0x9] sm:$0x1] }
  0x28   : > { %v751_v0 = vsel %vm235_vm5, %v750_v61, %v749_v62  ;;  %v1122_v20 = vsel %vm226_vm2, %v1121_v14, %v1120_v13  ;;  %v1425_v22 = vld [vmem:[%s2050_s27 + $0xd] sm:$0x1]  ;;  %v1426_v23 = vld [vmem:[%s2050_s27 + $0x11] sm:$0x1]  ;;  %v1422_v25 = vld [vmem:[%s2050_s27 + $0x1] sm:$0x1] }
  0x29   : > { %v753_v2 = vsel %vm238_vm6, %v752_v63, %v751_v0  ;;  %v1124_v24 = vsel %vm229_vm3, %v1123_v15, %v1122_v20  ;;  %v1427_v26 = vld [vmem:[%s2050_s27 + $0x15] sm:$0x1]  ;;  %v1428_v28 = vld [vmem:[%s2050_s27 + $0x19] sm:$0x1]  ;;  %v1470_v29 = vrot.slane %v1423_v19, 7  ;;  %v1472_v30 = vrot.slane %v1424_v21, 6 }
  0x2a   : > { %754 = vrot.lane.b32.xlu1 %v753_v2, %s1960_s28  ;;  %v1126_v27 = vsel %vm232_vm4, %v1125_v16, %v1124_v24  ;;  %v1474_v31 = vrot.slane %v1425_v22, 5  ;;  %v1429_v33 = vld [vmem:[%s2050_s27 + $0x1d] sm:$0x1]  ;;  %v1476_v34 = vrot.slane %v1426_v23, 4  ;;  %v1478_v37 = vrot.slane %v1427_v26, 3  ;;  %s1604_s12 = scalar_lea.sflag [#allocation3], %s168_s7 }
  0x2b   : > { %v1128_v32 = vsel %vm235_vm5, %v1127_v17, %v1126_v27  ;;  %v1471_v36 = vsel %vm220_vm0, %v1470_v29, %v1422_v25  ;;  %v1480_v39 = vrot.slane %v1428_v28, 2  ;;  %v1482_v41 = vrot.slane %v1429_v33, 1  ;;  %v1415_v46 = vld [vmem:[%s2050_s27 + $0x4] sm:$0x1]  ;;  %v1416_v47 = vld [vmem:[%s2050_s27 + $0x8] sm:$0x1] }
  0x2c   : > { %v1130_v35 = vsel %vm238_vm6, %v1129_v18, %v1128_v32  ;;  %v1473_v38 = vsel %vm223_vm1, %v1472_v30, %v1471_v36  ;;  %v1446_v48 = vrot.slane %v1415_v46, 7  ;;  %v1414_v49 = vld [vmem:[%s2050_s27] sm:$0x1]  ;;  %v1417_v50 = vld [vmem:[%s2050_s27 + $0xc] sm:$0x1]  ;;  %v1448_v51 = vrot.slane %v1416_v47, 6 }
  0x2d   : > { %v1475_v40 = vsel %vm226_vm2, %v1474_v31, %v1473_v38  ;;  %v1418_v52 = vld [vmem:[%s2050_s27 + $0x10] sm:$0x1]  ;;  %v1450_v54 = vrot.slane %v1417_v50, 5  ;;  %v1419_v55 = vld [vmem:[%s2050_s27 + $0x14] sm:$0x1] }
  0x2e   : > { %v1477_v42 = vsel %vm229_vm3, %v1476_v34, %v1475_v40  ;;  %v1447_v53 = vsel %vm220_vm0, %v1446_v48, %v1414_v49  ;;  %v1452_v57 = vrot.slane %v1418_v52, 4  ;;  %v1420_v58 = vld [vmem:[%s2050_s27 + $0x18] sm:$0x1]  ;;  %v1454_v60 = vrot.slane %v1419_v55, 3  ;;  %v1421_v61 = vld [vmem:[%s2050_s27 + $0x1c] sm:$0x1] }
  0x2f   : > { %v1479_v43 = vsel %vm232_vm4, %v1478_v37, %v1477_v42  ;;  %v1449_v56 = vsel %vm223_vm1, %v1448_v51, %v1447_v53  ;;  %v1456_v63 = vrot.slane %v1420_v58, 2  ;;  %v1458_v1 = vrot.slane %v1421_v61, 1  ;;  %v360_v4 = vld [vmem:[%s2050_s27 + $0x4] sm:$0x1]  ;;  %v717_v5 = vld [vmem:[%s2050_s27 + $0x5] sm:$0x1] }
  0x30   : > { %v1481_v44 = vsel %vm235_vm5, %v1480_v39, %v1479_v43  ;;  %v1451_v59 = vsel %vm226_vm2, %v1450_v54, %v1449_v56  ;;  %v359_v6 = vld [vmem:[%s2050_s27] sm:$0x1]  ;;  %v391_v7 = vrot.slane %v360_v4, 7  ;;  %v361_v8 = vld [vmem:[%s2050_s27 + $0x8] sm:$0x1]  ;;  %v764_v16 = vrot.slane %v717_v5, 7 }
  0x31   : > { %v1483_v45 = vsel %vm238_vm6, %v1482_v41, %v1481_v44  ;;  %v1453_v62 = vsel %vm229_vm3, %v1452_v57, %v1451_v59  ;;  %v362_v9 = vld [vmem:[%s2050_s27 + $0xc] sm:$0x1]  ;;  %v363_v10 = vld [vmem:[%s2050_s27 + $0x10] sm:$0x1]  ;;  %v716_v11 = vld [vmem:[%s2050_s27 + $0x1] sm:$0x1] }
  0x32   : > { %1131 = vrot.lane.b32.xlu1 %v1130_v35, %s1961_s29  ;;  %v1455_v0 = vsel %vm232_vm4, %v1454_v60, %v1453_v62  ;;  %v364_v12 = vld [vmem:[%s2050_s27 + $0x14] sm:$0x1]  ;;  %v392_v13 = vsel %vm220_vm0, %v391_v7, %v359_v6  ;;  %v393_v14 = vrot.slane %v361_v8, 6  ;;  %v395_v15 = vrot.slane %v362_v9, 5  ;;  %v365_v17 = vld [vmem:[%s2050_s27 + $0x18] sm:$0x1] }
  0x33   : > { %v1457_v2 = vsel %vm235_vm5, %v1456_v63, %v1455_v0  ;;  %v397_v18 = vrot.slane %v363_v10, 4  ;;  %v399_v19 = vrot.slane %v364_v12, 3  ;;  %v718_v20 = vld [vmem:[%s2050_s27 + $0x9] sm:$0x1]  ;;  %v366_v21 = vld [vmem:[%s2050_s27 + $0x1c] sm:$0x1]  ;;  %v765_v33 = vsel %vm220_vm0, %v764_v16, %v716_v11 }
  0x34   : > { %v1459_v3 = vsel %vm238_vm6, %v1458_v1, %v1457_v2  ;;  %v394_v22 = vsel %vm223_vm1, %v393_v14, %v392_v13  ;;  %v401_v23 = vrot.slane %v365_v17, 2  ;;  %v719_v24 = vld [vmem:[%s2050_s27 + $0xd] sm:$0x1]  ;;  %v403_v26 = vrot.slane %v366_v21, 1  ;;  %v1062_v27 = vld [vmem:[%s2050_s27 + $0x4] sm:$0x1] }
  0x35   : > { %v396_v25 = vsel %vm226_vm2, %v395_v15, %v394_v22  ;;  %v1063_v29 = vld [vmem:[%s2050_s27 + $0x8] sm:$0x1]  ;;  %v1064_v30 = vld [vmem:[%s2050_s27 + $0xc] sm:$0x1]  ;;  %v1065_v31 = vld [vmem:[%s2050_s27 + $0x10] sm:$0x1] }
  0x36   : > { %v398_v28 = vsel %vm229_vm3, %v397_v18, %v396_v25  ;;  %v766_v34 = vrot.slane %v718_v20, 6  ;;  %v1061_v36 = vld [vmem:[%s2050_s27] sm:$0x1]  ;;  %v1066_v37 = vld [vmem:[%s2050_s27 + $0x14] sm:$0x1]  ;;  %v1093_v41 = vrot.slane %v1062_v27, 7 }
  0x37   : > { %v400_v35 = vsel %vm232_vm4, %v399_v19, %v398_v28  ;;  %v1067_v40 = vld [vmem:[%s2050_s27 + $0x18] sm:$0x1]  ;;  %v1095_v42 = vrot.slane %v1063_v29, 6  ;;  %v368_v43 = vld [vmem:[%s2050_s27 + $0x5] sm:$0x1]  ;;  %v1097_v46 = vrot.slane %v1064_v30, 5 }
  0x38   : > { %v402_v39 = vsel %vm235_vm5, %v401_v23, %v400_v35  ;;  %v1099_v47 = vrot.slane %v1065_v31, 4  ;;  %v720_v48 = vld [vmem:[%s2050_s27 + $0x11] sm:$0x1]  ;;  %v768_v49 = vrot.slane %v719_v24, 5  ;;  %v1094_v50 = vsel %vm220_vm0, %v1093_v41, %v1061_v36  ;;  %v369_v55 = vld [vmem:[%s2050_s27 + $0x9] sm:$0x1] }
  0x39   : > { %v404_v44 = vsel %vm238_vm6, %v403_v26, %v402_v39  ;;  %v1101_v51 = vrot.slane %v1066_v37, 3  ;;  %v767_v52 = vsel %vm223_vm1, %v766_v34, %v765_v33  ;;  %v1096_v53 = vsel %vm223_vm1, %v1095_v42, %v1094_v50  ;;  %v721_v59 = vld [vmem:[%s2050_s27 + $0x15] sm:$0x1]  ;;  %v367_v61 = vld [vmem:[%s2050_s27 + $0x1] sm:$0x1] }
  0x3a   : > { %1484 = vrot.lane.b32.xlu1 %v1483_v45, %s1962_s30  ;;  %v1068_v45 = vld [vmem:[%s2050_s27 + $0x1c] sm:$0x1]  ;;  %v1103_v54 = vrot.slane %v1067_v40, 2  ;;  %v415_v56 = vrot.slane %v368_v43, 7  ;;  %v1098_v57 = vsel %vm226_vm2, %v1097_v46, %v1096_v53  ;;  %v770_v60 = vrot.slane %v720_v48, 4 }
  0x3b   : > { %v1105_v58 = vrot.slane %v1068_v45, 1  ;;  %v1100_v62 = vsel %vm229_vm3, %v1099_v47, %v1098_v57  ;;  %v769_v63 = vsel %vm226_vm2, %v768_v49, %v767_v52  ;;  %v370_v1 = vld [vmem:[%s2050_s27 + $0xd] sm:$0x1]  ;;  %v417_v2 = vrot.slane %v369_v55, 6  ;;  %v722_v4 = vld [vmem:[%s2050_s27 + $0x19] sm:$0x1] }
  0x3c   : > { %v1102_v0 = vsel %vm232_vm4, %v1101_v51, %v1100_v62  ;;  %v772_v5 = vrot.slane %v721_v59, 3  ;;  %v416_v6 = vsel %vm220_vm0, %v415_v56, %v367_v61  ;;  %v771_v8 = vsel %vm229_vm3, %v770_v60, %v769_v63  ;;  %v371_v9 = vld [vmem:[%s2050_s27 + $0x11] sm:$0x1]  ;;  %v723_v11 = vld [vmem:[%s2050_s27 + $0x1d] sm:$0x1] }
  0x3d   : > { %v419_v10 = vrot.slane %v370_v1, 5  ;;  %v774_v12 = vrot.slane %v722_v4, 2  ;;  %v418_v13 = vsel %vm223_vm1, %v417_v2, %v416_v6  ;;  %v372_v15 = vld [vmem:[%s2050_s27 + $0x15] sm:$0x1]  ;;  %v421_v16 = vrot.slane %v371_v9, 4 }
  0x3e   : > { %v773_v14 = vsel %vm232_vm4, %v772_v5, %v771_v8  ;;  %v776_v17 = vrot.slane %v723_v11, 1  ;;  %v373_v20 = vld [vmem:[%s2050_s27 + $0x19] sm:$0x1]  ;;  %v423_v21 = vrot.slane %v372_v15, 3  ;;  %v374_v24 = vld [vmem:[%s2050_s27 + $0x1d] sm:$0x1] }
  0x3f   : > { %v420_v18 = vsel %vm226_vm2, %v419_v10, %v418_v13  ;;  %v775_v19 = vsel %vm235_vm5, %v774_v12, %v773_v14  ;;  %v425_v25 = vrot.slane %v373_v20, 2  ;;  %v427_v27 = vrot.slane %v374_v24, 1  ;;  %v546_v31 = vld [vmem:[%s2050_s27 + $0x5] sm:$0x1]  ;;  %v547_v33 = vld [vmem:[%s2050_s27 + $0x9] sm:$0x1] }
  0x40   : > { %v422_v22 = vsel %vm229_vm3, %v421_v16, %v420_v18  ;;  %v777_v23 = vsel %vm238_vm6, %v776_v17, %v775_v19  ;;  %v593_v34 = vrot.slane %v546_v31, 7  ;;  %v545_v36 = vld [vmem:[%s2050_s27 + $0x1] sm:$0x1]  ;;  %v548_v37 = vld [vmem:[%s2050_s27 + $0xd] sm:$0x1] }
  0x41   : > { %v424_v26 = vsel %vm232_vm4, %v423_v21, %v422_v22  ;;  %v549_v39 = vld [vmem:[%s2050_s27 + $0x11] sm:$0x1]  ;;  %v550_v40 = vld [vmem:[%s2050_s27 + $0x15] sm:$0x1]  ;;  %v551_v41 = vld [vmem:[%s2050_s27 + $0x19] sm:$0x1] }
  0x42   : > { %1460 = vrot.lane.b32.xlu1 %v1459_v3, %s1962_s30  ;;  %v1104_v3 = vsel %vm235_vm5, %v1103_v54, %v1102_v0  ;;  %v426_v28 = vsel %vm235_vm5, %v425_v25, %v424_v26  ;;  %v594_v42 = vsel %vm220_vm0, %v593_v34, %v545_v36  ;;  %v597_v46 = vrot.slane %v548_v37, 5  ;;  %v537_v52 = vld [vmem:[%s2050_s27] sm:$0x1]  ;;  %v538_v53 = vld [vmem:[%s2050_s27 + $0x4] sm:$0x1] }
  0x43   : > { %v1106_v7 = vsel %vm238_vm6, %v1105_v58, %v1104_v3  ;;  %v428_v29 = vsel %vm238_vm6, %v427_v27, %v426_v28  ;;  %v599_v47 = vrot.slane %v549_v39, 4  ;;  %v601_v48 = vrot.slane %v550_v40, 3  ;;  %v539_v55 = vld [vmem:[%s2050_s27 + $0x8] sm:$0x1]  ;;  %v540_v56 = vld [vmem:[%s2050_s27 + $0xc] sm:$0x1] }
  0x44   : > { %1107 = vrot.lane.b32.xlu2 %v1106_v7, %s1961_s29  ;;  %v603_v50 = vrot.slane %v551_v41, 2  ;;  %v541_v57 = vld [vmem:[%s2050_s27 + $0x10] sm:$0x1]  ;;  %v542_v60 = vld [vmem:[%s2050_s27 + $0x14] sm:$0x1]  ;;  %v569_v61 = vrot.slane %v538_v53, 7 }
  0x45   : > { %v571_v62 = vrot.slane %v539_v55, 6  ;;  %v543_v63 = vld [vmem:[%s2050_s27 + $0x18] sm:$0x1]  ;;  %v573_v0 = vrot.slane %v540_v56, 5  ;;  %v575_v1 = vrot.slane %v541_v57, 4  ;;  %v577_v2 = vrot.slane %v542_v60, 3 }
  0x46   : > { %v544_v4 = vld [vmem:[%s2050_s27 + $0x1c] sm:$0x1]  ;;  %v570_v5 = vsel %vm220_vm0, %v569_v61, %v537_v52  ;;  %v579_v6 = vrot.slane %v543_v63, 2  ;;  %v899_v7 = vld [vmem:[%s2050_s27 + $0x5] sm:$0x1] }
  0x47   : > { %v572_v9 = vsel %vm223_vm1, %v571_v62, %v570_v5  ;;  %v581_v10 = vrot.slane %v544_v4, 1  ;;  %v898_v11 = vld [vmem:[%s2050_s27 + $0x1] sm:$0x1]  ;;  %v900_v12 = vld [vmem:[%s2050_s27 + $0x9] sm:$0x1]  ;;  %v946_v13 = vrot.slane %v899_v7, 7 }
  0x48   : > { %v574_v14 = vsel %vm226_vm2, %v573_v0, %v572_v9  ;;  %v901_v15 = vld [vmem:[%s2050_s27 + $0xd] sm:$0x1]  ;;  %v902_v16 = vld [vmem:[%s2050_s27 + $0x11] sm:$0x1]  ;;  %v903_v17 = vld [vmem:[%s2050_s27 + $0x15] sm:$0x1] }
  0x49   : > { %v576_v19 = vsel %vm229_vm3, %v575_v1, %v574_v14  ;;  %v904_v20 = vld [vmem:[%s2050_s27 + $0x19] sm:$0x1]  ;;  %v905_v21 = vld [vmem:[%s2050_s27 + $0x1d] sm:$0x1]  ;;  %v947_v22 = vsel %vm220_vm0, %v946_v13, %v898_v11  ;;  %v950_v24 = vrot.slane %v901_v15, 5  ;;  %v952_v26 = vrot.slane %v902_v16, 4 }
  0x4a   : > { %405 = vrot.lane.b32.xlu1 %v404_v44, %s1963_s3  ;;  %v552_v44 = vld [vmem:[%s2050_s27 + $0x1d] sm:$0x1]  ;;  %v578_v25 = vsel %vm232_vm4, %v577_v2, %v576_v19  ;;  %v954_v27 = vrot.slane %v903_v17, 3  ;;  %v890_v28 = vld [vmem:[%s2050_s27] sm:$0x1]  ;;  %v958_v34 = vrot.slane %v905_v21, 1 }
  0x4b   : > { %v605_v51 = vrot.slane %v552_v44, 1  ;;  %v891_v36 = vld [vmem:[%s2050_s27 + $0x4] sm:$0x1]  ;;  %v892_v37 = vld [vmem:[%s2050_s27 + $0x8] sm:$0x1] }
  0x4c   : > { %v893_v41 = vld [vmem:[%s2050_s27 + $0xc] sm:$0x1]  ;;  %v1243_v53 = vld [vmem:[%s2050_s27] sm:$0x1]  ;;  %v1244_v57 = vld [vmem:[%s2050_s27 + $0x4] sm:$0x1] }
  0x4d   : > { %v1246_v62 = vld [vmem:[%s2050_s27 + $0xc] sm:$0x1]  ;;  %v1275_v63 = vrot.slane %v1244_v57, 7  ;;  %v1248_v2 = vld [vmem:[%s2050_s27 + $0x14] sm:$0x1] }
  0x4e   : > { %v1250_v5 = vld [vmem:[%s2050_s27 + $0x1c] sm:$0x1]  ;;  %v1252_v9 = vld [vmem:[%s2050_s27 + $0x5] sm:$0x1]  ;;  %v1283_v13 = vrot.slane %v1248_v2, 3 }
  0x4f   : > { %v1251_v14 = vld [vmem:[%s2050_s27 + $0x1] sm:$0x1]  ;;  %v1253_v15 = vld [vmem:[%s2050_s27 + $0x9] sm:$0x1]  ;;  %v1254_v21 = vld [vmem:[%s2050_s27 + $0xd] sm:$0x1] }
  0x50   : > { %v207_v57 = vld [vmem:[%s2050_s27 + $0x12] sm:$0x1] }
  0x9c   : > { %v2216_v30 = vpop.permute.xlu1 %754 }
  0xa3   : > { %v2168_v32 = vpop.f32.mrf.mxu0 }
  0xa4   : > { %v287_v38 = vsel %vm262_vm7, %v2168_v32, -inf  ;;  %v2220_v35 = vpop.permute.xlu1 %1131 }
  0xa5   : > { %288 = vmax.xlane.f32.xlu0 %v287_v38  ;;  %v595_v38 = vrot.slane %v547_v33, 6  ;;  %v956_v33 = vrot.slane %v904_v20, 2 }
  0xa7   : > { %v596_v45 = vsel %vm223_vm1, %v595_v38, %v594_v42  ;;  %v894_v42 = vld [vmem:[%s2050_s27 + $0x10] sm:$0x1] }
  0xa8   : > { %v598_v54 = vsel %vm226_vm2, %v597_v46, %v596_v45  ;;  %v896_v46 = vld [vmem:[%s2050_s27 + $0x18] sm:$0x1]  ;;  %v928_v52 = vrot.slane %v894_v42, 4 }
  0xa9   : > { %v600_v59 = vsel %vm229_vm3, %v599_v47, %v598_v54  ;;  %v897_v47 = vld [vmem:[%s2050_s27 + $0x1c] sm:$0x1]  ;;  %v932_v61 = vrot.slane %v896_v46, 2 }
  0xaa   : > { %v934_v1 = vrot.slane %v897_v47, 1 }
  0xac   : > { %v2254_v18 = vpop.permute.xlu1 %1484 }
  0xb9   : > { %778 = vrot.lane.b32.xlu0 %v777_v23, %s1960_s28  ;;  %v948_v23 = vrot.slane %v900_v12, 6 }
  0xbb   : > { %v949_v31 = vsel %vm223_vm1, %v948_v23, %v947_v22  ;;  %v1255_v22 = vld [vmem:[%s2050_s27 + $0x11] sm:$0x1]  ;;  %v1299_v23 = vrot.slane %v1252_v9, 7 }
  0xbc   : > { %v951_v40 = vsel %vm226_vm2, %v950_v24, %v949_v31  ;;  %v1301_v31 = vrot.slane %v1253_v15, 6 }
  0xbd   : > { %v953_v45 = vsel %vm229_vm3, %v952_v26, %v951_v40  ;;  %v1287_v26 = vrot.slane %v1250_v5, 1  ;;  %v1257_v40 = vld [vmem:[%s2050_s27 + $0x19] sm:$0x1] }
  0xc1   : > { %429 = vrot.lane.b32.xlu0 %v428_v29, %s1963_s3  ;;  %v580_v29 = vsel %vm235_vm5, %v579_v6, %v578_v25  ;;  %v1276_v6 = vsel %vm220_vm0, %v1275_v63, %v1243_v53  ;;  %v327_v63 = vrot.slane %v207_v57, 4 }
  0xc2   : > { %v582_v39 = vsel %vm238_vm6, %v581_v10, %v580_v29  ;;  %v1461_v10 = vpop.permute.xlu1 %1460  ;;  %v1300_v29 = vsel %vm220_vm0, %v1299_v23, %v1251_v14 }
  0xc3   : > { %583 = vrot.lane.b32.xlu1 %v582_v39, %s1964_s4 }
  0xca   : > { %v406_v46 = vpop.permute.xlu1 %405 }
 0x118   : > { %v289_v43 = vpop.xlane.xlu0 %288 }
 0x119   : > { %v290_v49 = vsub.f32 %v2168_v32, %v289_v43  ;;  %v602_v32 = vsel %vm232_vm4, %v601_v48, %v600_v59  ;;  %v895_v43 = vld [vmem:[%s2050_s27 + $0x14] sm:$0x1]  ;;  %v922_v48 = vrot.slane %v891_v36, 7  ;;  %v1305_v36 = vrot.slane %v1255_v22, 4 }
 0x11a   : > { %v604_v3 = vsel %vm235_vm5, %v603_v50, %v602_v32  ;;  %v924_v50 = vrot.slane %v892_v37, 6  ;;  %v930_v56 = vrot.slane %v895_v43, 3  ;;  %v1247_v32 = vld [vmem:[%s2050_s27 + $0x10] sm:$0x1] }
 0x11b   : > { %v291_v58 = vmul.f32 1.442695, %v290_v49  ;;  %v606_v8 = vsel %vm238_vm6, %v605_v51, %v604_v3  ;;  %v955_v49 = vsel %vm232_vm4, %v954_v27, %v953_v45  ;;  %v926_v51 = vrot.slane %v893_v41, 5  ;;  %v1249_v3 = vld [vmem:[%s2050_s27 + $0x18] sm:$0x1] }
 0x11c   : > { %607 = vrot.lane.b32.xlu0 %v606_v8, %s1964_s4  ;;  %v957_v54 = vsel %vm235_vm5, %v956_v33, %v955_v49  ;;  %v923_v55 = vsel %vm220_vm0, %v922_v48, %v890_v28  ;;  %v1279_v8 = vrot.slane %v1246_v62, 5  ;;  %v1281_v12 = vrot.slane %v1247_v32, 4  ;;  %v1256_v28 = vld [vmem:[%s2050_s27 + $0x15] sm:$0x1] }
 0x11d   : > { %1848 = vpow2.f32 %v291_v58  ;;  %v1245_v58 = vld [vmem:[%s2050_s27 + $0x8] sm:$0x1]  ;;  %v959_v59 = vsel %vm238_vm6, %v958_v34, %v957_v54  ;;  %v925_v60 = vsel %vm223_vm1, %v924_v50, %v923_v55  ;;  %v1285_v20 = vrot.slane %v1249_v3, 2  ;;  %v203_v54 = vld [vmem:[%s2050_s27 + $0x2] sm:$0x1] }
 0x11e   : > { %v927_v0 = vsel %vm226_vm2, %v926_v51, %v925_v60  ;;  %v1277_v7 = vrot.slane %v1245_v58, 6  ;;  %v1303_v33 = vrot.slane %v1254_v21, 5  ;;  %v1307_v42 = vrot.slane %v1256_v28, 3  ;;  %v204_v51 = vld [vmem:[%s2050_s27 + $0x6] sm:$0x1] }
 0x11f   : > { %v929_v4 = vsel %vm229_vm3, %v928_v52, %v927_v0  ;;  %v1309_v45 = vrot.slane %v1257_v40, 2  ;;  %v205_v52 = vld [vmem:[%s2050_s27 + $0xa] sm:$0x1]  ;;  %v321_v53 = vrot.slane %v204_v51, 7  ;;  %v206_v55 = vld [vmem:[%s2050_s27 + $0xe] sm:$0x1] }
 0x120   : > { %v931_v11 = vsel %vm232_vm4, %v930_v56, %v929_v4  ;;  %v1278_v19 = vsel %vm223_vm1, %v1277_v7, %v1276_v6  ;;  %v323_v56 = vrot.slane %v205_v52, 6  ;;  %v208_v58 = vld [vmem:[%s2050_s27 + $0x16] sm:$0x1]  ;;  %v325_v32 = vrot.slane %v206_v55, 5 }
 0x121   : > { %v933_v17 = vsel %vm235_vm5, %v932_v61, %v931_v11  ;;  %v1280_v25 = vsel %vm226_vm2, %v1279_v8, %v1278_v19  ;;  %v322_v60 = vsel %vm220_vm0, %v321_v53, %v203_v54  ;;  %v210_v61 = vld [vmem:[%s2050_s27 + $0x1e] sm:$0x1]  ;;  %v329_v0 = vrot.slane %v208_v58, 3 }
 0x122   : > { %v935_v24 = vsel %vm238_vm6, %v934_v1, %v933_v17  ;;  %v1282_v27 = vsel %vm229_vm3, %v1281_v12, %v1280_v25  ;;  %v324_v62 = vsel %vm223_vm1, %v323_v56, %v322_v60  ;;  %v333_v3 = vrot.slane %v210_v61, 1  ;;  %v725_v56 = vld [vmem:[%s2050_s27 + $0x6] sm:$0x1]  ;;  %v726_v60 = vld [vmem:[%s2050_s27 + $0xa] sm:$0x1] }
 0x123   : > { %v2266_v38 = vpop.eup %1848  ;;  %936 = vrot.lane.b32.xlu1 %v935_v24, %s1965_s5  ;;  %v1284_v34 = vsel %vm232_vm4, %v1283_v13, %v1282_v27  ;;  %v326_v2 = vsel %vm226_vm2, %v325_v32, %v324_v62  ;;  %v839_v61 = vrot.slane %v725_v56, 7  ;;  %v724_v62 = vld [vmem:[%s2050_s27 + $0x2] sm:$0x1] }
 0x124   : > { %v293_v44 = vsel %vm262_vm7, %v2266_v38, 0.0  ;;  %960 = vrot.lane.b32.xlu0 %v959_v59, %s1965_s5  ;;  %v1286_v37 = vsel %vm235_vm5, %v1285_v20, %v1284_v34  ;;  %v209_v59 = vld [vmem:[%s2050_s27 + $0x1a] sm:$0x1]  ;;  %v328_v4 = vsel %vm229_vm3, %v327_v63, %v326_v2  ;;  %v727_v63 = vld [vmem:[%s2050_s27 + $0xe] sm:$0x1] }
 0x125   : > { %294 = vadd.xlane.f32.xlu2 %v293_v44  ;;  %v1288_v39 = vsel %vm238_vm6, %v1287_v26, %v1286_v37  ;;  %v1258_v44 = vld [vmem:[%s2050_s27 + $0x1d] sm:$0x1]  ;;  %v331_v1 = vrot.slane %v209_v59, 2  ;;  %v330_v5 = vsel %vm232_vm4, %v329_v0, %v328_v4  ;;  %v841_v0 = vrot.slane %v726_v60, 6  ;;  %v375_v56 = vld [vmem:[%s2050_s27 + $0x2] sm:$0x1] }
 0x126   : > { %v1311_v48 = vrot.slane %v1258_v44, 1  ;;  %v840_v2 = vsel %vm220_vm0, %v839_v61, %v724_v62  ;;  %v843_v4 = vrot.slane %v727_v63, 5  ;;  %v378_v62 = vld [vmem:[%s2050_s27 + $0xe] sm:$0x1] }
 0x127   : > { %v332_v6 = vsel %vm235_vm5, %v331_v1, %v330_v5  ;;  %v728_v1 = vld [vmem:[%s2050_s27 + $0x12] sm:$0x1]  ;;  %v842_v5 = vsel %vm223_vm1, %v841_v0, %v840_v2 }
 0x128   : > { %v334_v7 = vsel %vm238_vm6, %v333_v3, %v332_v6  ;;  %v1431_v3 = vld [vmem:[%s2050_s27 + $0x6] sm:$0x1]  ;;  %v845_v6 = vrot.slane %v728_v1, 4  ;;  %v1436_v1 = vld [vmem:[%s2050_s27 + $0x1a] sm:$0x1] }
 0x129   : > { %354 = vmatpush.msra.mxu1 %v334_v7  ;;  %v1430_v7 = vld [vmem:[%s2050_s27 + $0x2] sm:$0x1] }
 0x12b   : > { %v779_v16 = vpop.permute.xlu0 %778 }
 0x12c   : > { %1754 = vmatpush.xpose.msk.msrb.mxu0 %vm262_vm7, %v779_v16  ;;  %1289 = vrot.lane.b32.xlu0 %v1288_v39, %s1966_s6 }
 0x12f   : > { %1755 = vmatmul.msk.f32.vlgmr.msrb.gmra.mxu0 %vm262_vm7, %v2216_v30 }
 0x130   : > { %1762 = vmatpush.xpose.msk.msra.mxu0 %vm262_vm7, %v2220_v35  ;;  %v1302_v35 = vsel %vm223_vm1, %v1301_v31, %v1300_v29 }
 0x131   : > { %v1304_v41 = vsel %vm226_vm2, %v1303_v33, %v1302_v35 }
 0x132   : > { %v1306_v43 = vsel %vm229_vm3, %v1305_v36, %v1304_v41 }
 0x133   : > { %v430_v30 = vpop.permute.xlu0 %429  ;;  %v1308_v47 = vsel %vm232_vm4, %v1307_v42, %v1306_v43 }
 0x134   : > { %1770 = vmatpush.xpose.msk.msrb.mxu0 %vm262_vm7, %v2254_v18  ;;  %1746 = vmatpush.xpose.msk.msra.mxu2 %vm262_vm7, %v430_v30  ;;  %v1108_v18 = vpop.permute.xlu2 %1107  ;;  %v1310_v49 = vsel %vm235_vm5, %v1309_v45, %v1308_v47 }
 0x135   : > { %v1312_v50 = vsel %vm238_vm6, %v1311_v48, %v1310_v49  ;;  %v584_v25 = vpop.permute.xlu1 %583 }
 0x137   : > { %1747 = vmatmul.msk.f32.vlgmr.msra.gmra.mxu2 %vm262_vm7, %v406_v46  ;;  %1763 = vmatmul.msk.f32.vlgmr.msra.gmra.mxu0 %vm262_vm7, %v1108_v18 }
 0x13d   : > { %1313 = vrot.lane.b32.xlu2 %v1312_v50, %s1966_s6 }
 0x13f   : > { %1771 = vmatmul.msk.f32.vlgmr.msrb.gmra.mxu0 %vm262_vm7, %v1461_v10 }
 0x18e   : > { %v608_v8 = vpop.permute.xlu0 %607 }
 0x18f   : > { %1750 = vmatpush.xpose.msk.msrb.mxu1 %vm262_vm7, %v608_v8  ;;  %v1432_v8 = vld [vmem:[%s2050_s27 + $0xa] sm:$0x1] }
 0x195   : > { %v937_v28 = vpop.permute.xlu1 %936 }
 0x196   : > { %v961_v22 = vpop.permute.xlu0 %960 }
 0x198   : > { %v295_v9 = vpop.xlane.xlu2 %294 }
 0x199   : > { %1850 = vrcp.f32 %v295_v9  ;;  %v307_v13 = vand.u32 2147483648, %v295_v9  ;;  %v305_v15 = vand.u32 2147483647, %v295_v9  ;;  %vm301_vm9 = vweird.f32 %v295_v9 }
 0x19b   : > { %v308_v17 = vor.u32 1.1754944e-38, %v307_v13  ;;  %vm306_vm11 = vcmp.eq.f32.partialorder %v305_v15, 8.507059e+37  ;;  %v1077_v13 = vld [vmem:[%s2050_s27 + $0x2] sm:$0x1]  ;;  %v1079_v15 = vld [vmem:[%s2050_s27 + $0xa] sm:$0x1] }
 0x19e   : > { %v1290_v36 = vpop.permute.xlu0 %1289 }
 0x19f   : > { %v1851_v10 = vpop.eup %1850 }
 0x1a0   : > { %v297_v11 = vmul.f32 %v1851_v10, %v295_v9  ;;  %vm302_vm8 = vweird.f32 %v1851_v10  ;;  %v1314_v26 = vpop.permute.xlu2 %1313  ;;  %v1545_v9 = vrot.slane %v1431_v3, 7 }
 0x1a1   : > { %vm303_vm10 = vmor %vm301_vm9, %vm302_vm8 }
 0x1a2   : > { %v298_v12 = vsub.f32 1.0, %v297_v11  ;;  %v729_v11 = vld [vmem:[%s2050_s27 + $0x16] sm:$0x1] }
 0x1a4   : > { %v299_v14 = vmul.f32 %v1851_v10, %v298_v12  ;;  %v1433_v12 = vld [vmem:[%s2050_s27 + $0xe] sm:$0x1] }
 0x1a6   : > { %v300_v16 = vadd.f32 %v1851_v10, %v299_v14  ;;  %v1078_v14 = vld [vmem:[%s2050_s27 + $0x6] sm:$0x1] }
 0x1a8   : > { %v304_v19 = vsel %vm303_vm10, %v1851_v10, %v300_v16  ;;  %v1080_v16 = vld [vmem:[%s2050_s27 + $0xe] sm:$0x1] }
 0x1a9   : > { %v309_v20 = vsel %vm306_vm11, %v308_v17, %v304_v19  ;;  %v1081_v17 = vld [vmem:[%s2050_s27 + $0x12] sm:$0x1]  ;;  %v1082_v19 = vld [vmem:[%s2050_s27 + $0x16] sm:$0x1] }
 0x1aa   : > { %v311_v21 = vmul.f32 %v2266_v38, %v309_v20  ;;  %v844_v20 = vsel %vm226_vm2, %v843_v4, %v842_v5 }
 0x1ac   : > { %312 = vst.msk [vmem:[%s2354_s15] sm:$0xff] %vm262_vm7, %v311_v21  ;;  %1745 = vmatmul.msk.f32.vlgmr.msra.gmra.mxu1 %vm262_vm7, %v311_v21  ;;  %v801_v23 = vpop.f32.mrf.mxu0  ;;  %v1547_v21 = vrot.slane %v1432_v8, 6  ;;  %v1437_v8 = vld [vmem:[%s2050_s27 + $0x1e] sm:$0x1] }
 0x1ad   : > { %v804_v24 = vsel %vm262_vm7, %v801_v23, -inf  ;;  %1758 = vmatpush.xpose.msk.msra.mxu1 %vm262_vm7, %v961_v22  ;;  %v1083_v22 = vld [vmem:[%s2050_s27 + $0x1a] sm:$0x1] }
 0x1ae   : > { %805 = vmax.xlane.f32.xlu1 %v804_v24  ;;  %v1194_v24 = vrot.slane %v1079_v15, 6 }
 0x1b4   : > { %1751 = vmatmul.msk.f32.vlgmr.msrb.gmra.mxu1 %vm262_vm7, %v584_v25  ;;  %v1154_v27 = vpop.f32.mrf.mxu0 }
 0x1b5   : > { %v1157_v38 = vsel %vm262_vm7, %v1154_v27, -inf  ;;  %1766 = vmatpush.xpose.msk.msrb.mxu1 %vm262_vm7, %v1314_v26  ;;  %v1546_v26 = vsel %vm220_vm0, %v1545_v9, %v1430_v7  ;;  %v494_v7 = vrot.slane %v378_v62, 5  ;;  %v1555_v9 = vrot.slane %v1436_v1, 2 }
 0x1b6   : > { %1158 = vmax.xlane.f32.xlu0 %v1157_v38  ;;  %v1196_v38 = vrot.slane %v1080_v16, 5  ;;  %v1557_v16 = vrot.slane %v1437_v8, 1 }
 0x1ba   : > { %v452_v29 = vpop.f32.mrf.mxu2 }
 0x1bb   : > { %v455_v31 = vsel %vm262_vm7, %v452_v29, -inf }
 0x1bc   : > { %v1507_v33 = vpop.f32.mrf.mxu0  ;;  %456 = vmax.xlane.f32.xlu1 %v455_v31  ;;  %1759 = vmatmul.msk.f32.vlgmr.msra.gmra.mxu1 %vm262_vm7, %v937_v28  ;;  %v1198_v28 = vrot.slane %v1081_v17, 4  ;;  %v376_v31 = vld [vmem:[%s2050_s27 + $0x6] sm:$0x1] }
 0x1bd   : > { %v1510_v34 = vsel %vm262_vm7, %v1507_v33, -inf }
 0x1be   : > { %1511 = vmax.xlane.f32.xlu2 %v1510_v34  ;;  %v1200_v34 = vrot.slane %v1082_v19, 3 }
 0x1c4   : > { %1767 = vmatmul.msk.f32.vlgmr.msrb.gmra.mxu1 %vm262_vm7, %v1290_v36  ;;  %v847_v36 = vrot.slane %v729_v11, 3 }
 0x221   : > { %v806_v37 = vpop.xlane.xlu1 %805 }
 0x222   : > { %v807_v35 = vsub.f32 %v801_v23, %v806_v37  ;;  %v1192_v23 = vrot.slane %v1078_v14, 7  ;;  %v1434_v37 = vld [vmem:[%s2050_s27 + $0x12] sm:$0x1]  ;;  %v380_v14 = vld [vmem:[%s2050_s27 + $0x16] sm:$0x1] }
 0x224   : > { %v808_v39 = vmul.f32 1.442695, %v807_v35  ;;  %v1549_v35 = vrot.slane %v1433_v12, 5 }
 0x226   : > { %1852 = vpow2.f32 %v808_v39 }
 0x229   : > { %v2368_v40 = vpop.f32.mrf.mxu1  ;;  %v1159_v41 = vpop.xlane.xlu0 %1158 }
 0x22a   : > { %v1160_v42 = vsub.f32 %v1154_v27, %v1159_v41  ;;  %v1084_v27 = vld [vmem:[%s2050_s27 + $0x1e] sm:$0x1]  ;;  %v1202_v41 = vrot.slane %v1083_v22, 2 }
 0x22c   : > { %v2370_v43 = vpop.eup %1852  ;;  %v1161_v30 = vmul.f32 1.442695, %v1160_v42  ;;  %v846_v42 = vsel %vm229_vm3, %v845_v6, %v844_v20  ;;  %v379_v6 = vld [vmem:[%s2050_s27 + $0x12] sm:$0x1]  ;;  %v381_v20 = vld [vmem:[%s2050_s27 + $0x1a] sm:$0x1] }
 0x22d   : > { %v810_v44 = vsel %vm262_vm7, %v2370_v43, 0.0  ;;  %v496_v15 = vrot.slane %v379_v6, 4  ;;  %v908_v6 = vld [vmem:[%s2050_s27 + $0xa] sm:$0x1] }
 0x22e   : > { %1854 = vpow2.f32 %v1161_v30  ;;  %811 = vadd.xlane.f32.xlu0 %v810_v44  ;;  %v1548_v30 = vsel %vm223_vm1, %v1547_v21, %v1546_v26  ;;  %v498_v21 = vrot.slane %v380_v14, 3 }
 0x22f   : > { %v457_v50 = vpop.xlane.xlu1 %456  ;;  %v1550_v60 = vsel %vm226_vm2, %v1549_v35, %v1548_v30 }
 0x230   : > { %v458_v54 = vsub.f32 %v452_v29, %v457_v50  ;;  %v730_v29 = vld [vmem:[%s2050_s27 + $0x1a] sm:$0x1] }
 0x231   : > { %v1512_v45 = vpop.xlane.xlu2 %1511  ;;  %v2374_v18 = vpop.f32.mrf.mxu1 }
 0x232   : > { %v1513_v46 = vsub.f32 %v1507_v33, %v1512_v45  ;;  %v459_v57 = vmul.f32 1.442695, %v458_v54  ;;  %v633_v32 = vsel %vm262_vm7, %v2374_v18, -inf  ;;  %v1193_v33 = vsel %vm220_vm0, %v1192_v23, %v1077_v13  ;;  %v1435_v54 = vld [vmem:[%s2050_s27 + $0x16] sm:$0x1] }
 0x233   : > { %v1195_v39 = vsel %vm223_vm1, %v1194_v24, %v1193_v33  ;;  %v1204_v45 = vrot.slane %v1084_v27, 1  ;;  %v1553_v2 = vrot.slane %v1435_v54, 3  ;;  %v382_v24 = vld [vmem:[%s2050_s27 + $0x1e] sm:$0x1] }
 0x234   : > { %v2376_v47 = vpop.eup %1854  ;;  %v1514_v48 = vmul.f32 1.442695, %v1513_v46  ;;  %v1197_v44 = vsel %vm226_vm2, %v1196_v38, %v1195_v39  ;;  %v731_v46 = vld [vmem:[%s2050_s27 + $0x1e] sm:$0x1]  ;;  %v502_v27 = vrot.slane %v382_v24, 1 }
 0x235   : > { %v1163_v49 = vsel %vm262_vm7, %v2376_v47, 0.0  ;;  %v1199_v50 = vsel %vm229_vm3, %v1198_v28, %v1197_v44  ;;  %v851_v0 = vrot.slane %v731_v46, 1 }
 0x236   : > { %1856 = vpow2.f32 %v1514_v48  ;;  %1164 = vadd.xlane.f32.xlu2 %v1163_v49  ;;  %v377_v48 = vld [vmem:[%s2050_s27 + $0xa] sm:$0x1]  ;;  %v490_v49 = vrot.slane %v376_v31, 7 }
 0x237   : > { %1858 = vpow2.f32 %v459_v57  ;;  %v1201_v57 = vsel %vm232_vm4, %v1200_v34, %v1199_v50 }
 0x238   : > { %v1203_v61 = vsel %vm235_vm5, %v1202_v41, %v1201_v57  ;;  %v491_v3 = vsel %vm220_vm0, %v490_v49, %v375_v56 }
 0x239   : > { %v2380_v51 = vpop.f32.mrf.mxu1  ;;  %v1205_v63 = vsel %vm238_vm6, %v1204_v45, %v1203_v61 }
 0x23a   : > { %v986_v52 = vsel %vm262_vm7, %v2380_v51, -inf }
 0x23b   : > { %987 = vmax.xlane.f32.xlu1 %v986_v52  ;;  %v849_v52 = vrot.slane %v730_v29, 2 }
 0x23c   : > { %v2384_v53 = vpop.eup %1856 }
 0x23d   : > { %v1516_v55 = vsel %vm262_vm7, %v2384_v53, 0.0  ;;  %v2404_v10 = vpop.eup %1858 }
 0x23e   : > { %1517 = vadd.xlane.f32.xlu0 %v1516_v55  ;;  %v461_v25 = vsel %vm262_vm7, %v2404_v10, 0.0  ;;  %v1551_v55 = vrot.slane %v1434_v37, 4 }
 0x240   : > { %v1552_v5 = vsel %vm229_vm3, %v1551_v55, %v1550_v60 }
 0x241   : > { %v2389_v58 = vpop.f32.mrf.mxu1  ;;  %v1554_v13 = vsel %vm232_vm4, %v1553_v2, %v1552_v5 }
 0x242   : > { %v1339_v59 = vsel %vm262_vm7, %v2389_v58, -inf  ;;  %v1556_v19 = vsel %vm235_vm5, %v1555_v9, %v1554_v13 }
 0x243   : > { %1340 = vmax.xlane.f32.xlu1 %v1339_v59  ;;  %v848_v59 = vsel %vm232_vm4, %v847_v36, %v846_v42  ;;  %v1558_v23 = vsel %vm238_vm6, %v1557_v16, %v1556_v19  ;;  %v1023_v16 = vrot.slane %v908_v6, 6 }
 0x244   : > { %v850_v4 = vsel %vm235_vm5, %v849_v52, %v848_v59 }
 0x245   : > { %v852_v12 = vsel %vm238_vm6, %v851_v0, %v850_v4 }
 0x246   : > { %634 = vmax.xlane.f32.xlu0 %v633_v32  ;;  %v492_v32 = vrot.slane %v377_v48, 6 }
 0x248   : > { %v493_v11 = vsel %vm223_vm1, %v492_v32, %v491_v3 }
 0x249   : > { %v495_v17 = vsel %vm226_vm2, %v494_v7, %v493_v11  ;;  %v906_v11 = vld [vmem:[%s2050_s27 + $0x2] sm:$0x1] }
 0x24a   : > { %v497_v22 = vsel %vm229_vm3, %v496_v15, %v495_v17 }
 0x24b   : > { %v499_v26 = vsel %vm232_vm4, %v498_v21, %v497_v22 }
 0x24e   : > { %462 = vadd.xlane.f32.xlu0 %v461_v25  ;;  %1206 = vrot.lane.b32.xlu2 %v1205_v63, %s1961_s29  ;;  %v500_v25 = vrot.slane %v381_v20, 2  ;;  %v907_v63 = vld [vmem:[%s2050_s27 + $0x6] sm:$0x1]  ;;  %v910_v20 = vld [vmem:[%s2050_s27 + $0x12] sm:$0x1] }
 0x24f   : > { %v1021_v7 = vrot.slane %v907_v63, 7 }
 0x250   : > { %v501_v38 = vsel %vm235_vm5, %v500_v25, %v499_v26  ;;  %v1260_v26 = vld [vmem:[%s2050_s27 + $0x6] sm:$0x1] }
 0x251   : > { %v503_v28 = vsel %vm238_vm6, %v502_v27, %v501_v38  ;;  %v1022_v17 = vsel %vm220_vm0, %v1021_v7, %v906_v11  ;;  %v1261_v27 = vld [vmem:[%s2050_s27 + $0xa] sm:$0x1] }
 0x252   : > { %v1024_v25 = vsel %vm223_vm1, %v1023_v16, %v1022_v17  ;;  %v1266_v17 = vld [vmem:[%s2050_s27 + $0x1e] sm:$0x1] }
 0x25c   : > { %853 = vrot.lane.b32.xlu1 %v852_v12, %s1960_s28 }
 0x262   : > { %1559 = vrot.lane.b32.xlu0 %v1558_v23, %s1962_s30  ;;  %s1620_s30 = scalar_lea.hbm %s2634_s2, %s1780_s24 }
 0x26a   : > { %504 = vrot.lane.b32.xlu0 %v503_v28, %s1963_s3  ;;  %v1262_v28 = vld [vmem:[%s2050_s27 + $0xe] sm:$0x1]  ;;  %s1621_s3 = sshll.u32 %s2354_s15, 4  ;;  %s1622_s3 = int_to_ptr.vmem [resolvable:$true] %s1621_s3 }
 0x2a1   : > { %v812_v29 = vpop.xlane.xlu0 %811 }
 0x2a2   : > { %1860 = vrcp.f32 %v812_v29  ;;  %v824_v35 = vand.u32 2147483648, %v812_v29  ;;  %v822_v39 = vand.u32 2147483647, %v812_v29  ;;  %vm818_vm13 = vweird.f32 %v812_v29 }
 0x2a4   : > { %v825_v45 = vor.u32 1.1754944e-38, %v824_v35  ;;  %vm823_vm15 = vcmp.eq.f32.partialorder %v822_v39, 8.507059e+37  ;;  %v1263_v39 = vld [vmem:[%s2050_s27 + $0x12] sm:$0x1] }
 0x2a8   : > { %v1861_v31 = vpop.eup %1860 }
 0x2a9   : > { %v814_v33 = vmul.f32 %v1861_v31, %v812_v29  ;;  %v1165_v34 = vpop.xlane.xlu2 %1164  ;;  %vm819_vm12 = vweird.f32 %v1861_v31 }
 0x2aa   : > { %1862 = vrcp.f32 %v1165_v34  ;;  %vm820_vm14 = vmor %vm818_vm13, %vm819_vm12  ;;  %v1177_v55 = vand.u32 2147483648, %v1165_v34  ;;  %vm1171_vm9 = vweird.f32 %v1165_v34 }
 0x2ab   : > { %v815_v36 = vsub.f32 1.0, %v814_v33  ;;  %v1027_v33 = vrot.slane %v910_v20, 4 }
 0x2ac   : > { %v1178_v32 = vor.u32 1.1754944e-38, %v1177_v55  ;;  %v553_v55 = vld [vmem:[%s2050_s27 + $0x2] sm:$0x1] }
 0x2ad   : > { %v816_v37 = vmul.f32 %v1861_v31, %v815_v36  ;;  %v1259_v36 = vld [vmem:[%s2050_s27 + $0x2] sm:$0x1] }
 0x2ae   : > { %v988_v41 = vpop.xlane.xlu1 %987 }
 0x2af   : > { %v817_v42 = vadd.f32 %v1861_v31, %v816_v37  ;;  %v989_v30 = vsub.f32 %v2380_v51, %v988_v41  ;;  %v1175_v51 = vand.u32 2147483647, %v1165_v34  ;;  %v1374_v41 = vrot.slane %v1260_v26, 7 }
 0x2b0   : > { %v1863_v44 = vpop.eup %1862 }
 0x2b1   : > { %v1167_v46 = vmul.f32 %v1863_v44, %v1165_v34  ;;  %v990_v48 = vmul.f32 1.442695, %v989_v30  ;;  %v1518_v49 = vpop.xlane.xlu0 %1517  ;;  %v821_v50 = vsel %vm820_vm14, %v1861_v31, %v817_v42  ;;  %vm1172_vm8 = vweird.f32 %v1863_v44  ;;  %v911_v31 = vld [vmem:[%s2050_s27 + $0x16] sm:$0x1]  ;;  %v1207_v16 = vpop.permute.xlu2 %1206 }
 0x2b2   : > { %1864 = vrcp.f32 %v1518_v49  ;;  %v826_v54 = vsel %vm823_vm15, %v825_v45, %v821_v50  ;;  %vm1173_vm10 = vmor %vm1171_vm9, %vm1172_vm8  ;;  %vm1176_vm11 = vcmp.eq.f32.partialorder %v1175_v51, 8.507059e+37  ;;  %v1530_v12 = vand.u32 2147483648, %v1518_v49  ;;  %v912_v45 = vld [vmem:[%s2050_s27 + $0x1a] sm:$0x1] }
 0x2b3   : > { %v1168_v52 = vsub.f32 1.0, %v1167_v46  ;;  %1866 = vpow2.f32 %v990_v48  ;;  %v2464_v56 = vmul.f32 %v2370_v43, %v826_v54  ;;  %v1528_v15 = vand.u32 2147483647, %v1518_v49 }
 0x2b4   : > { %vm1524_vm13 = vweird.f32 %v1518_v49  ;;  %v1531_v19 = vor.u32 1.1754944e-38, %v1530_v12  ;;  %v1376_v42 = vrot.slane %v1261_v27, 6  ;;  %v1029_v46 = vrot.slane %v911_v31, 3 }
 0x2b5   : > { %v1169_v57 = vmul.f32 %v1863_v44, %v1168_v52  ;;  %1756 = vst.msk [vmem:[%s2354_s15 + $0x18] sm:$0xff] %vm262_vm7, %v2464_v56  ;;  %vm1529_vm15 = vcmp.eq.f32.partialorder %v1528_v15, 8.507059e+37  ;;  %v1375_v48 = vsel %vm220_vm0, %v1374_v41, %v1259_v36  ;;  %v1264_v52 = vld [vmem:[%s2050_s27 + $0x16] sm:$0x1]  ;;  %v1380_v51 = vrot.slane %v1263_v39, 4 }
 0x2b6   : > { %v1341_v59 = vpop.xlane.xlu1 %1340  ;;  %v1377_v54 = vsel %vm223_vm1, %v1376_v42, %v1375_v48  ;;  %v1031_v63 = vrot.slane %v912_v45, 2 }
 0x2b7   : > { %v1170_v60 = vadd.f32 %v1863_v44, %v1169_v57  ;;  %v1342_v61 = vsub.f32 %v2389_v58, %v1341_v59  ;;  %v556_v59 = vld [vmem:[%s2050_s27 + $0xe] sm:$0x1] }
 0x2b8   : > { %v1865_v62 = vpop.eup %1864  ;;  %v672_v6 = vrot.slane %v556_v59, 5 }
 0x2b9   : > { %v2471_v0 = vpop.eup %1866  ;;  %v1174_v43 = vsel %vm1173_vm10, %v1863_v44, %v1170_v60  ;;  %v1520_v1 = vmul.f32 %v1865_v62, %v1518_v49  ;;  %v1343_v2 = vmul.f32 1.442695, %v1342_v61  ;;  %v635_v3 = vpop.xlane.xlu0 %634  ;;  %vm1525_vm12 = vweird.f32 %v1865_v62  ;;  %v554_v44 = vld [vmem:[%s2050_s27 + $0x6] sm:$0x1]  ;;  %v555_v49 = vld [vmem:[%s2050_s27 + $0xa] sm:$0x1] }
 0x2ba   : > { %v1179_v4 = vsel %vm1176_vm11, %v1178_v32, %v1174_v43  ;;  %v636_v5 = vsub.f32 %v2374_v18, %v635_v3  ;;  %v992_v58 = vsel %vm262_vm7, %v2471_v0, 0.0  ;;  %v909_v18 = vld [vmem:[%s2050_s27 + $0xe] sm:$0x1]  ;;  %vm1526_vm14 = vmor %vm1524_vm13, %vm1525_vm12  ;;  %v668_v60 = vrot.slane %v554_v44, 7  ;;  %v913_v32 = vld [vmem:[%s2050_s27 + $0x1e] sm:$0x1] }
 0x2bb   : > { %v1521_v8 = vsub.f32 1.0, %v1520_v1  ;;  %1868 = vpow2.f32 %v1343_v2  ;;  %993 = vadd.xlane.f32.xlu1 %v992_v58  ;;  %v2478_v9 = vmul.f32 %v2376_v47, %v1179_v4  ;;  %v1025_v21 = vrot.slane %v909_v18, 5  ;;  %v1265_v2 = vld [vmem:[%s2050_s27 + $0x1a] sm:$0x1]  ;;  %v557_v58 = vld [vmem:[%s2050_s27 + $0x12] sm:$0x1] }
 0x2bc   : > { %v637_v13 = vmul.f32 1.442695, %v636_v5  ;;  %v670_v61 = vrot.slane %v555_v49, 6  ;;  %v669_v3 = vsel %vm220_vm0, %v668_v60, %v553_v55  ;;  %v1382_v5 = vrot.slane %v1264_v52, 3 }
 0x2bd   : > { %v1522_v14 = vmul.f32 %v1865_v62, %v1521_v8  ;;  %1764 = vst.msk [vmem:[%s2354_s15 + $0x28] sm:$0xff] %vm262_vm7, %v2478_v9  ;;  %v1026_v35 = vsel %vm226_vm2, %v1025_v21, %v1024_v25  ;;  %v1033_v8 = vrot.slane %v913_v32, 1  ;;  %v674_v20 = vrot.slane %v557_v58, 4 }
 0x2be   : > { %1870 = vpow2.f32 %v637_v13  ;;  %v1028_v50 = vsel %vm229_vm3, %v1027_v33, %v1026_v35  ;;  %v671_v12 = vsel %vm223_vm1, %v670_v61, %v669_v3 }
 0x2bf   : > { %v1523_v47 = vadd.f32 %v1865_v62, %v1522_v14  ;;  %v1030_v1 = vsel %vm232_vm4, %v1029_v46, %v1028_v50  ;;  %v673_v25 = vsel %vm226_vm2, %v672_v6, %v671_v12 }
 0x2c0   : > { %v1032_v15 = vsel %vm235_vm5, %v1031_v63, %v1030_v1  ;;  %v675_v36 = vsel %vm229_vm3, %v674_v20, %v673_v25 }
 0x2c1   : > { %v2487_v22 = vpop.eup %1868  ;;  %v1527_v23 = vsel %vm1526_vm14, %v1865_v62, %v1523_v47  ;;  %v2489_v24 = vpop.xlane.xlu0 %462  ;;  %v1384_v47 = vrot.slane %v1265_v2, 2  ;;  %v1034_v27 = vsel %vm238_vm6, %v1033_v8, %v1032_v15 }
 0x2c2   : > { %v1532_v38 = vsel %vm1529_vm15, %v1531_v19, %v1527_v23  ;;  %1872 = vrcp.f32 %v2489_v24  ;;  %v1345_v29 = vsel %vm262_vm7, %v2487_v22, 0.0  ;;  %v475_v7 = vand.u32 2147483648, %v2489_v24  ;;  %v558_v19 = vld [vmem:[%s2050_s27 + $0x16] sm:$0x1] }
 0x2c3   : > { %v2500_v34 = vmul.f32 %v2384_v53, %v1532_v38  ;;  %1346 = vadd.xlane.f32.xlu0 %v1345_v29  ;;  %v1378_v53 = vrot.slane %v1262_v28, 5  ;;  %v473_v14 = vand.u32 2147483647, %v2489_v24  ;;  %vm469_vm0 = vweird.f32 %v2489_v24  ;;  %v559_v28 = vld [vmem:[%s2050_s27 + $0x1a] sm:$0x1] }
 0x2c4   : > { %v2503_v37 = vpop.eup %1870  ;;  %v476_v26 = vor.u32 1.1754944e-38, %v475_v7  ;;  %v676_v29 = vrot.slane %v558_v19, 3  ;;  %v678_v41 = vrot.slane %v559_v28, 2 }
 0x2c5   : > { %v639_v30 = vsel %vm262_vm7, %v2503_v37, 0.0  ;;  %1772 = vst.msk [vmem:[%s2354_s15 + $0x38] sm:$0xff] %vm262_vm7, %v2500_v34  ;;  %v1379_v43 = vsel %vm226_vm2, %v1378_v53, %v1377_v54  ;;  %vm474_vm9 = vcmp.eq.f32.partialorder %v473_v14, 8.507059e+37 }
 0x2c6   : > { %640 = vadd.xlane.f32.xlu2 %v639_v30  ;;  %v1381_v11 = vsel %vm229_vm3, %v1380_v51, %v1379_v43  ;;  %v677_v30 = vsel %vm232_vm4, %v676_v29, %v675_v36 }
 0x2c7   : > { %v1383_v23 = vsel %vm232_vm4, %v1382_v5, %v1381_v11 }
 0x2c8   : > { %v1873_v57 = vpop.eup %1872  ;;  %v1385_v33 = vsel %vm235_vm5, %v1384_v47, %v1383_v23 }
 0x2c9   : > { %v465_v62 = vmul.f32 %v1873_v57, %v2489_v24  ;;  %vm470_vm8 = vweird.f32 %v1873_v57  ;;  %v1386_v24 = vrot.slane %v1266_v17, 1 }
 0x2ca   : > { %vm471_vm1 = vmor %vm469_vm0, %vm470_vm8  ;;  %vm535_vm0 = vcmask 130048  }
 0x2cb   : > { %v466_v4 = vsub.f32 1.0, %v465_v62  ;;  %v1387_v42 = vsel %vm238_vm6, %v1386_v24, %v1385_v33 }
 0x2cd   : > { %v467_v13 = vmul.f32 %v1873_v57, %v466_v4 }
 0x2ce   : > { %v854_v18 = vpop.permute.xlu1 %853 }
 0x2cf   : > { %874 = vmatpush.msrb.mxu2 %v854_v18  ;;  %v468_v21 = vadd.f32 %v1873_v57, %v467_v13 }
 0x2d0   : > { %1757 = vmatmul.msk.f32.vlgmr.msrb.gmra.mxu2 %vm262_vm7, %v2464_v56  ;;  %v560_v56 = vld [vmem:[%s2050_s27 + $0x1e] sm:$0x1]  ;;  %s2583_s27 = scalar_lea.vmem %s2633_s1, %s1742_s18 }
 0x2d1   : > { %1227 = vmatpush.msra.mxu2 %v1207_v16  ;;  %v472_v38 = vsel %vm471_vm1, %v1873_v57, %v468_v21  ;;  %v680_v53 = vrot.slane %v560_v56, 1 }
 0x2d2   : > { %v477_v31 = vsel %vm474_vm9, %v476_v26, %v472_v38 }
 0x2d3   : > { %v479_v35 = vmul.f32 %v2404_v10, %v477_v31  ;;  %v679_v10 = vsel %vm235_vm5, %v678_v41, %v677_v30 }
 0x2d4   : > { %v1560_v39 = vpop.permute.xlu0 %1559  ;;  %1035 = vrot.lane.b32.xlu1 %v1034_v27, %s1965_s5  ;;  %v681_v44 = vsel %vm238_vm6, %v680_v53, %v679_v10 }
 0x2d5   : > { %1748 = vst.msk [vmem:[%s2354_s15 + $0x8] sm:$0xff] %vm262_vm7, %v479_v35  ;;  %1580 = vmatpush.msrb.mxu2 %v1560_v39 }
 0x2d7   : > { %1388 = vrot.lane.b32.xlu0 %v1387_v42, %s1966_s6 }
 0x2d8   : > { %1765 = vmatmul.msk.f32.vlgmr.msra.gmra.mxu2 %vm262_vm7, %v2478_v9 }
 0x2dc   : > { %v505_v45 = vpop.permute.xlu0 %504 }
 0x2dd   : > { %525 = vmatpush.msra.mxu3 %v505_v45 }
 0x2de   : > { %1749 = vmatmul.msk.f32.vlgmr.msra.gmra.mxu3 %vm262_vm7, %v479_v35  ;;  %682 = vrot.lane.b32.xlu2 %v681_v44, %s1964_s4  ;;  %s1623_s4 = sshll.u32 %s1620_s30, 4  ;;  %s1624_s4 = int_to_ptr.hbm [resolvable:$true] %s1623_s4 }
 0x2df   : > { %s1894_s23 = sshra.s32 %s1624_s4, 4  ;;  %s1895_s23 = int_to_ptr.hbm [resolvable:$true] %s1894_s23 }
 0x2e0   : > { %1773 = vmatmul.msk.f32.vlgmr.msrb.gmra.mxu2 %vm262_vm7, %v2500_v34  ;;  %s1896_s5 = scalar_lea.hbm %s1895_s23, 64  ;;  %p1901_p1 = scmp.lt.s32.totalorder %s1895_s23, %s2634_s2 }
 0x2e1   : > { %p1897_p12 = scmp.ne.s32.totalorder %s1895_s23, %s1896_s5 }
 0x2e3   : > { %p1898_p13 = pnand %p1897_p12, %p2027_p4 }
 0x2e5   : > { %p1899_p0 = pneg %p1898_p13 }
 0x32e   : > { %v994_v46 = vpop.xlane.xlu1 %993 }
 0x32f   : > { %1874 = vrcp.f32 %v994_v46  ;;  %v1006_v52 = vand.u32 2147483648, %v994_v46  ;;  %v1004_v57 = vand.u32 2147483647, %v994_v46  ;;  %vm1000_vm3 = vweird.f32 %v994_v46 }
 0x331   : > { %v1007_v59 = vor.u32 1.1754944e-38, %v1006_v52  ;;  %vm1005_vm5 = vcmp.eq.f32.partialorder %v1004_v57, 8.507059e+37 }
 0x335   : > { %v1875_v48 = vpop.eup %1874 }
 0x336   : > { %v996_v49 = vmul.f32 %v1875_v48, %v994_v46  ;;  %v1347_v9 = vpop.xlane.xlu0 %1346  ;;  %vm1001_vm2 = vweird.f32 %v1875_v48 }
 0x337   : > { %1876 = vrcp.f32 %v1347_v9  ;;  %vm1002_vm4 = vmor %vm1000_vm3, %vm1001_vm2  ;;  %v1359_v3 = vand.u32 2147483648, %v1347_v9  ;;  %v1357_v5 = vand.u32 2147483647, %v1347_v9  ;;  %vm1353_vm10 = vweird.f32 %v1347_v9 }
 0x338   : > { %v997_v50 = vsub.f32 1.0, %v996_v49 }
 0x339   : > { %v641_v54 = vpop.xlane.xlu2 %640  ;;  %v1360_v12 = vor.u32 1.1754944e-38, %v1359_v3  ;;  %vm1358_vm13 = vcmp.eq.f32.partialorder %v1357_v5, 8.507059e+37 }
 0x33a   : > { %v998_v55 = vmul.f32 %v1875_v48, %v997_v50  ;;  %1878 = vrcp.f32 %v641_v54  ;;  %v653_v6 = vand.u32 2147483648, %v641_v54  ;;  %v651_v11 = vand.u32 2147483647, %v641_v54 }
 0x33b   : > { %vm647_vm14 = vweird.f32 %v641_v54 }
 0x33c   : > { %v999_v51 = vadd.f32 %v1875_v48, %v998_v55  ;;  %v654_v18 = vor.u32 1.1754944e-38, %v653_v6  ;;  %vm652_vm8 = vcmp.eq.f32.partialorder %v651_v11, 8.507059e+37 }
 0x33d   : > { %v1877_v60 = vpop.eup %1876 }
 0x33e   : > { %v1003_v34 = vsel %vm1002_vm4, %v1875_v48, %v999_v51  ;;  %v1349_v62 = vmul.f32 %v1877_v60, %v1347_v9  ;;  %vm1354_vm6 = vweird.f32 %v1877_v60 }
 0x33f   : > { %v1008_v61 = vsel %vm1005_vm5, %v1007_v59, %v1003_v34  ;;  %vm1355_vm12 = vmor %vm1353_vm10, %vm1354_vm6 }
 0x340   : > { %v1879_v32 = vpop.eup %1878  ;;  %v1010_v63 = vmul.f32 %v2471_v0, %v1008_v61  ;;  %v1350_v43 = vsub.f32 1.0, %v1349_v62 }
 0x341   : > { %v643_v1 = vmul.f32 %v1879_v32, %v641_v54  ;;  %v683_v2 = vpop.permute.xlu2 %682  ;;  %vm648_vm11 = vweird.f32 %v1879_v32 }
 0x342   : > { %703 = vmatpush.msrb.mxu3 %v683_v2  ;;  %1760 = vst.msk [vmem:[%s2354_s15 + $0x20] sm:$0xff] %vm262_vm7, %v1010_v63  ;;  %v1351_v4 = vmul.f32 %v1877_v60, %v1350_v43  ;;  %vm649_vm15 = vmor %vm647_vm14, %vm648_vm11 }
 0x343   : > { %v644_v58 = vsub.f32 1.0, %v643_v1 }
 0x344   : > { %v1352_v7 = vadd.f32 %v1877_v60, %v1351_v4 }
 0x345   : > { %v645_v8 = vmul.f32 %v1879_v32, %v644_v58 }
 0x346   : > { %v1036_v0 = vpop.permute.xlu1 %1035  ;;  %v1356_v13 = vsel %vm1355_vm12, %v1877_v60, %v1352_v7 }
 0x347   : > { %v646_v14 = vadd.f32 %v1879_v32, %v645_v8  ;;  %1056 = vmatpush.msra.mxu3 %v1036_v0  ;;  %v1361_v15 = vsel %vm1358_vm13, %v1360_v12, %v1356_v13 }
 0x348   : > { %v1363_v17 = vmul.f32 %v2487_v22, %v1361_v15 }
 0x349   : > { %v650_v16 = vsel %vm649_vm15, %v1879_v32, %v646_v14  ;;  %v1389_v20 = vpop.permute.xlu0 %1388 }
 0x34a   : > { %v655_v47 = vsel %vm652_vm8, %v654_v18, %v650_v16  ;;  %1768 = vst.msk [vmem:[%s2354_s15 + $0x30] sm:$0xff] %vm262_vm7, %v1363_v17 }
 0x34b   : > { %v657_v19 = vmul.f32 %v2503_v37, %v655_v47 }
 0x34d   : > { %1752 = vst.msk [vmem:[%s2354_s15 + $0x10] sm:$0xff] %vm262_vm7, %v657_v19  ;;  %1753 = vmatmul.msk.f32.vlgmr.msrb.gmra.mxu3 %vm262_vm7, %v657_v19  ;;  %s1900_s15 = scalar_lea.hbm %s2634_s2, 128 }
 0x34e   : > { %1409 = vmatpush.msrb.mxu3 %v1389_v20  ;;  %p1902_p2 = scmp.lt.s32.totalorder %s1900_s15, %s1896_s5 }
 0x350   : > { %p1903_p3 = por %p1902_p2, %p1901_p1 }
 0x352   : > { %p1904_p5 = pnand %p1903_p3, %p1899_p0 }
 0x353   : > { %v876_v21 = vpop.f32.mrf.mxu2 }
 0x354   : > { %880 = vrot.lane.b32.xlu2 %v876_v21, %s1967_s16 }
 0x355   : > { %1761 = vmatmul.msk.f32.vlgmr.msra.gmra.mxu3 %vm262_vm7, %v1010_v63 }
 0x35b   : > { %v1229_v22 = vpop.f32.mrf.mxu2 }
 0x35c   : > { %1233 = vrot.lane.b32.xlu1 %v1229_v22, %s1967_s16 }
 0x35d   : > { %1769 = vmatmul.msk.f32.vlgmr.msrb.gmra.mxu3 %vm262_vm7, %v1363_v17 }
 0x361   : > { %v527_v37 = vpop.f32.mrf.mxu3 }
 0x363   : > { %v1582_v23 = vpop.f32.mrf.mxu2 }
 0x364   : > { %1586 = vrot.lane.b32.xlu2 %v1582_v23, %s1967_s16  ;;  %531 = vrot.lane.b32.xlu1 %v527_v37, %s1967_s16 }
 0x3ae   : > { %v881_v26 = vpop.permute.xlu2 %880 }
 0x3ce   : > { %v1234_v25 = vpop.permute.xlu1 %1233 }
 0x3d0   : > { %v705_v27 = vpop.f32.mrf.mxu3 }
 0x3d1   : > { %v883_v38 = vsel %vm262_vm7, %v705_v27, %v881_v26 }
 0x3d2   : > { %885 = vrot.lane.b32.xlu0 %v883_v38, %s1968_s20 }
 0x3d6   : > { %v532_v24 = vpop.permute.xlu1 %531 }
 0x3d7   : > { %v534_v28 = vsel %vm262_vm7, %v2368_v40, %v532_v24 }
 0x3d8   : > { %536 = vst.msk [vmem:[%s2583_s27] sm:$0xff] %vm535_vm0, %v534_v28  ;;  %v1058_v29 = vpop.f32.mrf.mxu3 }
 0x3d9   : > { %v1236_v31 = vsel %vm262_vm7, %v1058_v29, %v1234_v25 }
 0x3da   : > { %1907 = shalt.err (!%p1904_p5)
}
 0x3db   : > { %s1969_s7 = smov 128   ;;  %s1970_s24 = smov 32   ;;  %v1587_v40 = vpop.permute.xlu2 %1586  ;;  %vm888_vm1 = vcmask 261248   ;;  %vm1241_vm9 = vcmask 392448   ;;  %vm1594_vm2 = vcmask 523648  }
 0x3dc   : > { %1781 = dma.vmem_to_hbm [thread:$0]  (%p2027_p4), %s1622_s3, 1024, %s1624_s4, %s1604_s12, %s1969_s7, %s1969_s7, %s1967_s16  }
 0x3dd   : > { %1238 = vrot.lane.b32.xlu2 %v1236_v31, %s1970_s24  ;;  %s1971_s25 = smov 48  }
 0x3e0   : > { %v1411_v33 = vpop.f32.mrf.mxu3 }
 0x3e1   : > { %v1589_v36 = vsel %vm262_vm7, %v1411_v33, %v1587_v40 }
 0x3e2   : > { %1591 = vrot.lane.b32.xlu1 %v1589_v36, %s1971_s25 }
 0x437   : > { %v1239_v39 = vpop.permute.xlu2 %1238 }
 0x444   : > { %v886_v35 = vpop.permute.xlu0 %885 }
 0x445   : > { %889 = vst.msk [vmem:[%s2583_s27] sm:$0xff] %vm888_vm1, %v886_v35 }
 0x446   : > { %1242 = vst.msk [vmem:[%s2583_s27] sm:$0xff] %vm1241_vm9, %v1239_v39 }
 0x454   : > { %v1592_v56 = vpop.permute.xlu1 %1591 }
 0x455   : > { %1595 = vst.msk [vmem:[%s2583_s27] sm:$0xff] %vm1594_vm2, %v1592_v56 }
 0x456 PF: > { %p1787_p4 = scmp.ge.s32.totalorder %s1958_s14, 2  ;;  %s1648_s19 = sand.u32 1, %s1938_s9  }
 0x457   : > { %s1649_s16 = scalar_lea.sflag [#allocation3], %s1648_s19 }
 0x458   : > { %p1784_p6 = pnand %p1787_p4, %p2034_p8 }
 0x45a   : > { %p1785_p7 = pneg %p1784_p6 }
 0x45c   : > { %1933 = dma.done.wait (%p1785_p7), %s1649_s16, 1024  }
 0x45d   : > { %1935 = vsyncadd (%p1785_p7), %s1649_s16, 4294966272  ;;  %s16_s14 = sadd.s32 1, %s1958_s14   ;;  %s2637_s9 = smov %s1942_s10 }
 0x45e   : > { %p13_p9 = scmp.ge.s32.totalorder %s16_s14, 4   ;;  %s2638_s10 = smov %s1946_s11 }
 0x45f   : > { %s2639_s11 = smov %s2040_s22  ;;  %s2640_s12 = smov %s1954_s13 }
 0x460   : > { %s2641_s13 = smov %s2643_s17  ;;  %15 = sbr.rel (!%p13_p9) target bundleno = 4 (0x4), region = 78 }
 0x465   :  { %1655 = vsyncpa [#allocation3], 1 }
 0x466   :  { %1657 = vsyncpa [#allocation3 + $0x1], 1 }

</bundles_post_ra>
